<compile_context>
chip_gen: v7x
topology: tpu7x:2x2x1
jax: 0.10.0
libtpu: 0.0.40
codegen_flags: <defaults>
</compile_context>

<pallas_src>
import jax
import jax.numpy as jnp
from jax import lax
from jax.experimental import pallas as pl
from jax.experimental.pallas import tpu as pltpu


# --------------------------- Pallas kernel ----------------------------------
def bottleneck_kernel(x_ref, w1_ref, b1_ref, w2_ref, b2_ref, w3_ref, b3_ref,
                      o_ref, pad_ref):
    HW, Cin = x_ref.shape
    Hp2, Wp2, P = pad_ref.shape
    H, W = Hp2 - 2, Wp2 - 2

    x = x_ref[...]                                            # (HW, Cin) f32

    # --- conv1 (1x1, BN scale folded into weights) + bias + relu -------------
    h1 = jnp.dot(x.astype(jnp.bfloat16), w1_ref[...],
                 preferred_element_type=jnp.float32)
    h1 = jnp.maximum(h1 + b1_ref[...], 0.0)                   # (HW, P) f32

    # --- conv2 (3x3, stride 1, padding 1) ------------------------------------
    # Zero-padded activation lives in a VMEM scratch; the 9 taps are static
    # ref slices, concatenated along channels into one (HW, 9P) patch matrix
    # so the whole 3x3 conv is a single MXU matmul with K = 9*P.
    pad_ref[...] = jnp.zeros_like(pad_ref)
    pad_ref[1:H + 1, 1:W + 1, :] = h1.reshape(H, W, P)
    taps = [pad_ref[ky:ky + H, kx:kx + W, :].reshape(HW, P)
            for ky in range(3) for kx in range(3)]
    patches = jnp.concatenate(taps, axis=1)                   # (HW, 9P) f32
    h2 = jnp.dot(patches.astype(jnp.bfloat16), w2_ref[...],
                 preferred_element_type=jnp.float32)
    h2 = jnp.maximum(h2 + b2_ref[...], 0.0)                   # (HW, P) f32

    # --- conv3 (1x1) + bias + identity residual + relu -----------------------
    h3 = jnp.dot(h2.astype(jnp.bfloat16), w3_ref[...],
                 preferred_element_type=jnp.float32)
    o_ref[...] = jnp.maximum(h3 + b3_ref[...] + x, 0.0)       # (HW, Cout)


# --------------------------- wrapper -----------------------------------------
def bottleneck_pallas(x_nhwc, w1, b1, w2, b2, w3, b3):
    B, H, W, Cin = x_nhwc.shape
    P = w1.shape[1]
    Cout = w3.shape[1]
    HW = H * W

    x2d = x_nhwc.reshape(B * HW, Cin)                         # row-major, b-major rows

    def whole(arr):   # weights/biases: full block, constant index (tiny; no
        return pl.BlockSpec(arr.shape, lambda b: (0, 0))      # need for Buffered(1) at this size)

    out2d = pl.pallas_call(
        bottleneck_kernel,
        out_shape=jax.ShapeDtypeStruct((B * HW, Cout), jnp.float32),
        grid_spec=pltpu.PrefetchScalarGridSpec(
            num_scalar_prefetch=0,
            grid=(B,),
            in_specs=[
                pl.BlockSpec((HW, Cin), lambda b: (b, 0)),
                whole(w1), whole(b1),
                whole(w2), whole(b2),
                whole(w3), whole(b3),
            ],
            out_specs=pl.BlockSpec((HW, Cout), lambda b: (b, 0)),
            scratch_shapes=[pltpu.VMEM((H + 2, W + 2, P), jnp.float32)],
        ),
        compiler_params=pltpu.CompilerParams(
            dimension_semantics=("parallel",)),
    )(x2d, w1, b1, w2, b2, w3, b3)

    return out2d.reshape(B, H, W, Cout)


# --------------------------- parameter setup (deterministic) -----------------
def make_raw_params(key, inplanes, planes):
    P, Cout = planes, planes * 4
    ks = jax.random.split(key, 6)
    conv1_w = jax.random.normal(ks[0], (P, inplanes, 1, 1), jnp.float32) * 0.2
    conv2_w = jax.random.normal(ks[1], (P, P, 3, 3), jnp.float32) * 0.2
    conv3_w = jax.random.normal(ks[2], (Cout, P, 1, 1), jnp.float32) * 0.2

    def bn(k, c):
        k1, k2, k3, k4 = jax.random.split(k, 4)
        gamma = jax.random.uniform(k1, (c,), jnp.float32, 0.5, 1.5)
        beta = jax.random.normal(k2, (c,), jnp.float32) * 0.1
        mean = jax.random.normal(k3, (c,), jnp.float32) * 0.1
        var = jax.random.uniform(k4, (c,), jnp.float32, 0.5, 1.5)
        return gamma, beta, mean, var

    return conv1_w, conv2_w, conv3_w, bn(ks[3], P), bn(ks[4], P), bn(ks[5], Cout)


def fold_bn(p, eps=1e-5):
    gamma, beta, mean, var = p
    scale = gamma / jnp.sqrt(var + eps)
    bias = beta - mean * scale
    return scale, bias


def kernel_params(raw):
    """Fold BN scale into conv weights (bf16); biases stay f32 as (1, C) rows."""
    conv1_w, conv2_w, conv3_w, bn1, bn2, bn3 = raw
    P = conv2_w.shape[0]
    s1, b1 = fold_bn(bn1)
    s2, b2 = fold_bn(bn2)
    s3, b3 = fold_bn(bn3)
    w1 = (conv1_w[:, :, 0, 0].T * s1[None, :]).astype(jnp.bfloat16)        # (Cin, P)
    # (out,in,kh,kw) -> (kh,kw,in,out) -> (9*P, Pout); column index matches the
    # in-kernel tap order (ky*3 + kx)*P + c.
    w2 = (jnp.transpose(conv2_w, (2, 3, 1, 0)).reshape(9 * P, P)
          * s2[None, :]).astype(jnp.bfloat16)                               # (9P, P)
    w3 = (conv3_w[:, :, 0, 0].T * s3[None, :]).astype(jnp.bfloat16)        # (P, Cout)
    return w1, b1[None, :], w2, b2[None, :], w3, b3[None, :]


# --------------------------- pure-JAX reference ------------------------------
def bottleneck_ref(x_nhwc, raw):
    conv1_w, conv2_w, conv3_w, bn1, bn2, bn3 = raw

    def conv(x, w, pad):
        w_hwio = jnp.transpose(w, (2, 3, 1, 0))
        return lax.conv_general_dilated(
            x, w_hwio, (1, 1), pad,
            dimension_numbers=('NHWC', 'HWIO', 'NHWC'),
            precision=lax.Precision.HIGHEST)

    def bn_apply(x, p, eps=1e-5):
        g, b, m, v = p
        return (x - m) / jnp.sqrt(v + eps) * g + b

    out = jax.nn.relu(bn_apply(conv(x_nhwc, conv1_w, 'VALID'), bn1))
    out = jax.nn.relu(bn_apply(conv(out, conv2_w, [(1, 1), (1, 1)]), bn2))
    out = bn_apply(conv(out, conv3_w, 'VALID'), bn3)
    return jax.nn.relu(out + x_nhwc)


# --------------------------- main --------------------------------------------
if __name__ == "__main__":
    B, planes, H, W = 2, 4, 16, 16
    inplanes = planes * 4          # identity residual requires inplanes == planes*4

    key = jax.random.PRNGKey(0)
    kx, kp = jax.random.split(key)
    x_nchw = jax.random.normal(kx, (B, inplanes, H, W), jnp.float32)  # PyTorch NCHW
    x_nhwc = jnp.transpose(x_nchw, (0, 2, 3, 1))                      # kernel NHWC

    raw = make_raw_params(kp, inplanes, planes)
    params = kernel_params(raw)

    out = bottleneck_pallas(x_nhwc, *params)
    out = jax.block_until_ready(out)

    ref = bottleneck_ref(x_nhwc, raw)
    assert out.shape == (B, H, W, planes * 4)
    # Precision story: kernel matmuls use bf16 inputs with f32 accumulation,
    # reference uses f32 at HIGHEST precision.  Tolerance reflects that
    # bf16-input gap; a real indexing/weight-fold bug would give O(1) errors.
    assert jnp.allclose(out, ref, rtol=5e-2, atol=5e-2), "mismatch vs reference"

    print("KERNEL_OK")
</pallas_src>

<mosaic_0001>
module attributes {stable_mosaic.version = 11 : i64} {
  func.func @bottleneck_kernel(%arg0: i32, %arg1: memref<256x16xf32, #tpu.memory_space<vmem>>, %arg2: memref<16x4xbf16, #tpu.memory_space<vmem>>, %arg3: memref<1x4xf32, #tpu.memory_space<vmem>>, %arg4: memref<36x4xbf16, #tpu.memory_space<vmem>>, %arg5: memref<1x4xf32, #tpu.memory_space<vmem>>, %arg6: memref<4x16xbf16, #tpu.memory_space<vmem>>, %arg7: memref<1x16xf32, #tpu.memory_space<vmem>>, %arg8: memref<256x16xf32, #tpu.memory_space<vmem>>, %arg9: memref<18x18x4xf32, #tpu.memory_space<vmem>>) attributes {dimension_semantics = [#tpu.dimension_semantics<parallel>], iteration_bounds = array<i64: 2>, scalar_prefetch = 0 : i64, scratch_operands = 1 : i64, tpu.core_type = #tpu.core_type<tc>, window_params = [{transform_indices = @transform_0, window_bounds = array<i64: 256, 16>}, {pipeline_mode = #tpu.pipeline_mode<synchronous>, transform_indices = @transform_1, window_bounds = array<i64: 16, 4>}, {pipeline_mode = #tpu.pipeline_mode<synchronous>, transform_indices = @transform_2, window_bounds = array<i64: 1, 4>}, {pipeline_mode = #tpu.pipeline_mode<synchronous>, transform_indices = @transform_3, window_bounds = array<i64: 36, 4>}, {pipeline_mode = #tpu.pipeline_mode<synchronous>, transform_indices = @transform_4, window_bounds = array<i64: 1, 4>}, {pipeline_mode = #tpu.pipeline_mode<synchronous>, transform_indices = @transform_5, window_bounds = array<i64: 4, 16>}, {pipeline_mode = #tpu.pipeline_mode<synchronous>, transform_indices = @transform_6, window_bounds = array<i64: 1, 16>}, {transform_indices = @transform_7, window_bounds = array<i64: 256, 16>}]} {
    %c0 = arith.constant 0 : index
    %c0_0 = arith.constant 0 : index
    %0 = vector.load %arg1[%c0, %c0_0] : memref<256x16xf32, #tpu.memory_space<vmem>>, vector<256x16xf32>
    %1 = arith.truncf %0 : vector<256x16xf32> to vector<256x16xbf16>
    %c0_1 = arith.constant 0 : index
    %c0_2 = arith.constant 0 : index
    %2 = vector.load %arg2[%c0_1, %c0_2] : memref<16x4xbf16, #tpu.memory_space<vmem>>, vector<16x4xbf16>
    %cst = arith.constant dense<0.000000e+00> : vector<256x4xf32>
    %3 = tpu.matmul %1, %2, %cst {dimension_numbers = #tpu.dot_dimension_numbers<[1], [0], [0], [1], [0, 0, 1, 1], [], []>} : vector<256x16xbf16>, vector<16x4xbf16>, vector<256x4xf32> -> vector<256x4xf32>
    %c0_3 = arith.constant 0 : index
    %c0_4 = arith.constant 0 : index
    %4 = vector.load %arg3[%c0_3, %c0_4] : memref<1x4xf32, #tpu.memory_space<vmem>>, vector<1x4xf32>
    %5 = vector.broadcast %4 : vector<1x4xf32> to vector<256x4xf32>
    %6 = arith.addf %3, %5 : vector<256x4xf32>
    %cst_5 = arith.constant 0.000000e+00 : f32
    %7 = vector.broadcast %cst_5 : f32 to vector<256x4xf32>
    %8 = arith.maximumf %6, %7 : vector<256x4xf32>
    %cst_6 = arith.constant 0.000000e+00 : f32
    %9 = vector.broadcast %cst_6 : f32 to vector<18x18x4xf32>
    %c0_7 = arith.constant 0 : index
    %c0_8 = arith.constant 0 : index
    %c0_9 = arith.constant 0 : index
    %10 = vector.load %arg9[%c0_7, %c0_8, %c0_9] : memref<18x18x4xf32, #tpu.memory_space<vmem>>, vector<18x18x4xf32>
    tpu.vector_store %arg9[%c0_7, %c0_8, %c0_9], %9 {strides = array<i32>} : memref<18x18x4xf32, #tpu.memory_space<vmem>>, vector<18x18x4xf32>,
    %11 = vector.shape_cast %8 : vector<256x4xf32> to vector<16x16x4xf32>
    %c1 = arith.constant 1 : index
    %c1_10 = arith.constant 1 : index
    %c0_11 = arith.constant 0 : index
    %12 = vector.load %arg9[%c1, %c1_10, %c0_11] : memref<18x18x4xf32, #tpu.memory_space<vmem>>, vector<16x16x4xf32>
    tpu.vector_store %arg9[%c1, %c1_10, %c0_11], %11 {strides = array<i32>} : memref<18x18x4xf32, #tpu.memory_space<vmem>>, vector<16x16x4xf32>,
    %c0_12 = arith.constant 0 : index
    %c0_13 = arith.constant 0 : index
    %c0_14 = arith.constant 0 : index
    %13 = vector.load %arg9[%c0_12, %c0_13, %c0_14] : memref<18x18x4xf32, #tpu.memory_space<vmem>>, vector<16x16x4xf32>
    %14 = vector.shape_cast %13 : vector<16x16x4xf32> to vector<256x4xf32>
    %c0_15 = arith.constant 0 : index
    %c1_16 = arith.constant 1 : index
    %c0_17 = arith.constant 0 : index
    %15 = vector.load %arg9[%c0_15, %c1_16, %c0_17] : memref<18x18x4xf32, #tpu.memory_space<vmem>>, vector<16x16x4xf32>
    %16 = vector.shape_cast %15 : vector<16x16x4xf32> to vector<256x4xf32>
    %c0_18 = arith.constant 0 : index
    %c2 = arith.constant 2 : index
    %c0_19 = arith.constant 0 : index
    %17 = vector.load %arg9[%c0_18, %c2, %c0_19] : memref<18x18x4xf32, #tpu.memory_space<vmem>>, vector<16x16x4xf32>
    %18 = vector.shape_cast %17 : vector<16x16x4xf32> to vector<256x4xf32>
    %c1_20 = arith.constant 1 : index
    %c0_21 = arith.constant 0 : index
    %c0_22 = arith.constant 0 : index
    %19 = vector.load %arg9[%c1_20, %c0_21, %c0_22] : memref<18x18x4xf32, #tpu.memory_space<vmem>>, vector<16x16x4xf32>
    %20 = vector.shape_cast %19 : vector<16x16x4xf32> to vector<256x4xf32>
    %c1_23 = arith.constant 1 : index
    %c1_24 = arith.constant 1 : index
    %c0_25 = arith.constant 0 : index
    %21 = vector.load %arg9[%c1_23, %c1_24, %c0_25] : memref<18x18x4xf32, #tpu.memory_space<vmem>>, vector<16x16x4xf32>
    %22 = vector.shape_cast %21 : vector<16x16x4xf32> to vector<256x4xf32>
    %c1_26 = arith.constant 1 : index
    %c2_27 = arith.constant 2 : index
    %c0_28 = arith.constant 0 : index
    %23 = vector.load %arg9[%c1_26, %c2_27, %c0_28] : memref<18x18x4xf32, #tpu.memory_space<vmem>>, vector<16x16x4xf32>
    %24 = vector.shape_cast %23 : vector<16x16x4xf32> to vector<256x4xf32>
    %c2_29 = arith.constant 2 : index
    %c0_30 = arith.constant 0 : index
    %c0_31 = arith.constant 0 : index
    %25 = vector.load %arg9[%c2_29, %c0_30, %c0_31] : memref<18x18x4xf32, #tpu.memory_space<vmem>>, vector<16x16x4xf32>
    %26 = vector.shape_cast %25 : vector<16x16x4xf32> to vector<256x4xf32>
    %c2_32 = arith.constant 2 : index
    %c1_33 = arith.constant 1 : index
    %c0_34 = arith.constant 0 : index
    %27 = vector.load %arg9[%c2_32, %c1_33, %c0_34] : memref<18x18x4xf32, #tpu.memory_space<vmem>>, vector<16x16x4xf32>
    %28 = vector.shape_cast %27 : vector<16x16x4xf32> to vector<256x4xf32>
    %c2_35 = arith.constant 2 : index
    %c2_36 = arith.constant 2 : index
    %c0_37 = arith.constant 0 : index
    %29 = vector.load %arg9[%c2_35, %c2_36, %c0_37] : memref<18x18x4xf32, #tpu.memory_space<vmem>>, vector<16x16x4xf32>
    %30 = vector.shape_cast %29 : vector<16x16x4xf32> to vector<256x4xf32>
    %31 = tpu.concatenate %14, %16, %18, %20, %22, %24, %26, %28, %30 in 1 : vector<256x4xf32>, vector<256x4xf32>, vector<256x4xf32>, vector<256x4xf32>, vector<256x4xf32>, vector<256x4xf32>, vector<256x4xf32>, vector<256x4xf32>, vector<256x4xf32> -> vector<256x36xf32>
    %32 = arith.truncf %31 : vector<256x36xf32> to vector<256x36xbf16>
    %c0_38 = arith.constant 0 : index
    %c0_39 = arith.constant 0 : index
    %33 = vector.load %arg4[%c0_38, %c0_39] : memref<36x4xbf16, #tpu.memory_space<vmem>>, vector<36x4xbf16>
    %cst_40 = arith.constant dense<0.000000e+00> : vector<256x4xf32>
    %34 = tpu.matmul %32, %33, %cst_40 {dimension_numbers = #tpu.dot_dimension_numbers<[1], [0], [0], [1], [0, 0, 1, 1], [], []>} : vector<256x36xbf16>, vector<36x4xbf16>, vector<256x4xf32> -> vector<256x4xf32>
    %c0_41 = arith.constant 0 : index
    %c0_42 = arith.constant 0 : index
    %35 = vector.load %arg5[%c0_41, %c0_42] : memref<1x4xf32, #tpu.memory_space<vmem>>, vector<1x4xf32>
    %36 = vector.broadcast %35 : vector<1x4xf32> to vector<256x4xf32>
    %37 = arith.addf %34, %36 : vector<256x4xf32>
    %cst_43 = arith.constant 0.000000e+00 : f32
    %38 = vector.broadcast %cst_43 : f32 to vector<256x4xf32>
    %39 = arith.maximumf %37, %38 : vector<256x4xf32>
    %40 = arith.truncf %39 : vector<256x4xf32> to vector<256x4xbf16>
    %c0_44 = arith.constant 0 : index
    %c0_45 = arith.constant 0 : index
    %41 = vector.load %arg6[%c0_44, %c0_45] : memref<4x16xbf16, #tpu.memory_space<vmem>>, vector<4x16xbf16>
    %cst_46 = arith.constant dense<0.000000e+00> : vector<256x16xf32>
    %42 = tpu.matmul %40, %41, %cst_46 {dimension_numbers = #tpu.dot_dimension_numbers<[1], [0], [0], [1], [0, 0, 1, 1], [], []>} : vector<256x4xbf16>, vector<4x16xbf16>, vector<256x16xf32> -> vector<256x16xf32>
    %c0_47 = arith.constant 0 : index
    %c0_48 = arith.constant 0 : index
    %43 = vector.load %arg7[%c0_47, %c0_48] : memref<1x16xf32, #tpu.memory_space<vmem>>, vector<1x16xf32>
    %44 = vector.broadcast %43 : vector<1x16xf32> to vector<256x16xf32>
    %45 = arith.addf %42, %44 : vector<256x16xf32>
    %46 = arith.addf %45, %0 : vector<256x16xf32>
    %cst_49 = arith.constant 0.000000e+00 : f32
    %47 = vector.broadcast %cst_49 : f32 to vector<256x16xf32>
    %48 = arith.maximumf %46, %47 : vector<256x16xf32>
    %c0_50 = arith.constant 0 : index
    %c0_51 = arith.constant 0 : index
    %49 = vector.load %arg8[%c0_50, %c0_51] : memref<256x16xf32, #tpu.memory_space<vmem>>, vector<256x16xf32>
    tpu.vector_store %arg8[%c0_50, %c0_51], %48 {strides = array<i32>} : memref<256x16xf32, #tpu.memory_space<vmem>>, vector<256x16xf32>,
    return
  }
  func.func @transform_0(%arg0: i32) -> (i32, i32) {
    %c0_i32 = arith.constant 0 : i32
    %c0_i32_0 = arith.constant 0 : i32
    return %arg0, %c0_i32 : i32, i32
  }
  func.func @transform_1(%arg0: i32) -> (i32, i32) {
    %c0_i32 = arith.constant 0 : i32
    %c0_i32_0 = arith.constant 0 : i32
    %c0_i32_1 = arith.constant 0 : i32
    return %c0_i32, %c0_i32_0 : i32, i32
  }
  func.func @transform_2(%arg0: i32) -> (i32, i32) {
    %c0_i32 = arith.constant 0 : i32
    %c0_i32_0 = arith.constant 0 : i32
    %c0_i32_1 = arith.constant 0 : i32
    return %c0_i32, %c0_i32_0 : i32, i32
  }
  func.func @transform_3(%arg0: i32) -> (i32, i32) {
    %c0_i32 = arith.constant 0 : i32
    %c0_i32_0 = arith.constant 0 : i32
    %c0_i32_1 = arith.constant 0 : i32
    return %c0_i32, %c0_i32_0 : i32, i32
  }
  func.func @transform_4(%arg0: i32) -> (i32, i32) {
    %c0_i32 = arith.constant 0 : i32
    %c0_i32_0 = arith.constant 0 : i32
    %c0_i32_1 = arith.constant 0 : i32
    return %c0_i32, %c0_i32_0 : i32, i32
  }
  func.func @transform_5(%arg0: i32) -> (i32, i32) {
    %c0_i32 = arith.constant 0 : i32
    %c0_i32_0 = arith.constant 0 : i32
    %c0_i32_1 = arith.constant 0 : i32
    return %c0_i32, %c0_i32_0 : i32, i32
  }
  func.func @transform_6(%arg0: i32) -> (i32, i32) {
    %c0_i32 = arith.constant 0 : i32
    %c0_i32_0 = arith.constant 0 : i32
    %c0_i32_1 = arith.constant 0 : i32
    return %c0_i32, %c0_i32_0 : i32, i32
  }
  func.func @transform_7(%arg0: i32) -> (i32, i32) {
    %c0_i32 = arith.constant 0 : i32
    %c0_i32_0 = arith.constant 0 : i32
    return %arg0, %c0_i32 : i32, i32
  }
}

</mosaic_0001>

<bundles_post_ra>
// kernel: tpu_custom_call.1
= control target key start
LH: loop header
LB: loop body
LE: loop exit
PB: predicated region body
PF: predicated region fallthrough
CT: control target
= control target key end

     0   :  { %s3913_s24 = smov 0   ;;  %s5195_s0 = inlined_call_operand.vmem [shape: f32[512,16], index: 0, kind: input, shape index: {}]   ;;  %s5196_s1 = inlined_call_operand.vmem [shape: bf16[16,4], index: 1, kind: input, shape index: {}]   ;;  %s5197_s2 = inlined_call_operand.vmem [shape: f32[1,4], index: 2, kind: input, shape index: {}]   ;;  %s5198_s3 = inlined_call_operand.vmem [shape: bf16[36,4], index: 3, kind: input, shape index: {}]   ;;  %s5199_s4 = inlined_call_operand.vmem [shape: f32[1,4], index: 4, kind: input, shape index: {}]   ;;  %s5200_s5 = inlined_call_operand.vmem [shape: bf16[4,16], index: 5, kind: input, shape index: {}]   ;;  %s5201_s6 = inlined_call_operand.vmem [shape: f32[1,16], index: 6, kind: input, shape index: {}]   ;;  %s5202_s7 = inlined_call_operand.vmem [shape: f32[512,16], index: 7, kind: output, shape index: {}]  }
   0x1 LB: > { %s2929_s25 = sadd.s32 4294967295, %s3862_s24   ;;  %p2933_p0 = scmp.ge.s32.totalorder %s3862_s24, 1  ;;  %s3862_s24 = sphi %s3913_s24, %s17_s24  }
   0x2   : > { %p238_p1 = scmp.lt.s32.totalorder %s3862_s24, 3 }
   0x4   : > { %p239_p2 = pnand %p2933_p0, %p238_p1 }
   0x6   : > { %242 = sbr.rel (%p239_p2) target bundleno = 1065 (0x429), region = 48 }
   0xd   : > { %v3815_v0 = vld [vmem:[%s5196_s1] sm:$0xff]   ;;  %s2934_s28 = sshll.u32 %s2929_s25, 5  ;;  %vm346_vm0 = vcmask 130048   ;;  %vm588_vm1 = vcmask 31744   ;;  %vm591_vm2 = vcmask 25600   ;;  %v3864_v49 = vmov 0.0  }
   0xe   : > { %p271_p3 = scmp.lt.s32.totalorder %s2934_s28, 63  ;;  %3048 = vmatprep.subr.bf16.mxu0 %v3815_v0  ;;  %3154 = vmatprep.subr.bf16.mxu1 %v3815_v0  ;;  %596 = vst.msk [vmem:[#allocation2 + $0x30] sm:$0xff] %vm588_vm1, %v3864_v49  ;;  %597 = vst.msk [vmem:[#allocation2 + $0x38] sm:$0xff] %vm588_vm1, %v3864_v49  ;;  %s3865_s10 = smov 8   ;;  %v4041_v56 = vld [vmem:[%s5197_s2] ss:$0 sm:$0xff] }
   0xf   : > { %3049 = vmatpush3.bf16.msra.mxu0 %v3815_v0  ;;  %3155 = vmatpush3.bf16.msra.mxu1 %v3815_v0  ;;  %589 = vst.msk [vmem:[#allocation2] sm:$0xff] %vm588_vm1, %v3864_v49  ;;  %590 = vst.msk [vmem:[#allocation2 + $0x8] sm:$0xff] %vm588_vm1, %v3864_v49  ;;  %s3866_s11 = smov 4   ;;  %s3867_s14 = smov 24   ;;  %vm2344_vm3 = vcmask 1041408   ;;  %vm2022_vm4 = vcmask 64512  }
  0x10   : > { %s5233_s28 = smov (!%p271_p3, %s2934_s28), 63  ;;  %593 = vst.msk [vmem:[#allocation2 + $0x18] sm:$0xff] %vm588_vm1, %v3864_v49  ;;  %594 = vst.msk [vmem:[#allocation2 + $0x20] sm:$0xff] %vm588_vm1, %v3864_v49  ;;  %s3868_s15 = smov 12   ;;  %vm2055_vm5 = vcmask 97280   ;;  %vm2120_vm6 = vcmask 162816  }
  0x11   : > { %s2935_s29 = sshll.u32 %s5233_s28, 3  ;;  %599 = vst.msk [vmem:[#allocation2 + $0x48] sm:$0xff] %vm588_vm1, %v3864_v49  ;;  %600 = vst.msk [vmem:[#allocation2 + $0x50] sm:$0xff] %vm588_vm1, %v3864_v49  ;;  %s3869_s16 = smov 28   ;;  %vm2153_vm7 = vcmask 195584   ;;  %vm2186_vm8 = vcmask 228352  }
  0x12   : > { %s3932_s9 = scalar_lea.vmem %s5195_s0, %s2935_s29  ;;  %602 = vst.msk [vmem:[#allocation2 + $0x60] sm:$0xff] %vm588_vm1, %v3864_v49  ;;  %603 = vst.msk [vmem:[#allocation2 + $0x68] sm:$0xff] %vm588_vm1, %v3864_v49  ;;  %s3870_s17 = smov 16   ;;  %vm2219_vm9 = vcmask 261120   ;;  %vm2295_vm10 = vcmask 293888  }
  0x13   : > { %v283_v1 = vld [vmem:[%s3932_s9] sm:$0xff]  ;;  %v284_v2 = vld [vmem:[%s3932_s9 + $0x8] sm:$0xff]  ;;  %v285_v3 = vld [vmem:[%s3932_s9 + $0x10] sm:$0xff]  ;;  %605 = vst.msk [vmem:[#allocation2 + $0x78] sm:$0xff] %vm588_vm1, %v3864_v49  ;;  %s3871_s18 = smov 32   ;;  %s3872_s19 = smov 20  }
  0x14   : > { %v315_v4 = vpack.c.bf16 %v284_v2, %v283_v1  ;;  %v286_v5 = vld [vmem:[%s3932_s9 + $0x18] sm:$0xff]  ;;  %v299_v6 = vld [vmem:[%s3932_s9 + $0x80] sm:$0xff]  ;;  %v300_v7 = vld [vmem:[%s3932_s9 + $0x88] sm:$0xff]  ;;  %606 = vst.msk [vmem:[#allocation2 + $0x80] sm:$0xff] %vm588_vm1, %v3864_v49 }
  0x15   : > { %v316_v8 = vpack.c.bf16 %v286_v5, %v285_v3  ;;  %v323_v9 = vpack.c.bf16 %v300_v7, %v299_v6  ;;  %v301_v10 = vld [vmem:[%s3932_s9 + $0x90] sm:$0xff]  ;;  %v302_v11 = vld [vmem:[%s3932_s9 + $0x98] sm:$0xff]  ;;  %v287_v12 = vld [vmem:[%s3932_s9 + $0x20] sm:$0xff]  ;;  %608 = vst.msk [vmem:[#allocation2 + $0x90] sm:$0xff] %vm588_vm1, %v3864_v49 }
  0x16   : > { %3050 = vmatprep.mubr.msk.bf16.mxu0 %vm346_vm0, %v315_v4  ;;  %v324_v13 = vpack.c.bf16 %v302_v11, %v301_v10  ;;  %v288_v14 = vld [vmem:[%s3932_s9 + $0x28] sm:$0xff]  ;;  %v303_v16 = vld [vmem:[%s3932_s9 + $0xa0] sm:$0xff]  ;;  %v289_v18 = vld [vmem:[%s3932_s9 + $0x30] sm:$0xff]  ;;  %609 = vst.msk [vmem:[#allocation2 + $0x98] sm:$0xff] %vm588_vm1, %v3864_v49 }
  0x17   : > { %3051 = vmatmul.mubr.msk.bf16.vlgmr.msra.gmra.mrb[0].mxu0 %vm346_vm0, %v316_v8  ;;  %3066 = vmatprep.mubr.msk.bf16.mxu1 %vm346_vm0, %v323_v9  ;;  %v317_v15 = vpack.c.bf16 %v288_v14, %v287_v12  ;;  %v304_v17 = vld [vmem:[%s3932_s9 + $0xa8] sm:$0xff]  ;;  %v290_v19 = vld [vmem:[%s3932_s9 + $0x38] sm:$0xff]  ;;  %v305_v21 = vld [vmem:[%s3932_s9 + $0xb0] sm:$0xff]  ;;  %611 = vst.msk [vmem:[#allocation2 + $0xa8] sm:$0xff] %vm588_vm1, %v3864_v49 }
  0x18   : > { %3067 = vmatmul.mubr.msk.bf16.vlgmr.msra.gmra.mrb[0].mxu1 %vm346_vm0, %v324_v13  ;;  %v325_v20 = vpack.c.bf16 %v304_v17, %v303_v16  ;;  %v306_v22 = vld [vmem:[%s3932_s9 + $0xb8] sm:$0xff]  ;;  %v291_v23 = vld [vmem:[%s3932_s9 + $0x40] sm:$0xff]  ;;  %v292_v24 = vld [vmem:[%s3932_s9 + $0x48] sm:$0xff]  ;;  %v318_v27 = vpack.c.bf16 %v290_v19, %v289_v18  ;;  %612 = vst.msk [vmem:[#allocation2 + $0xb0] sm:$0xff] %vm588_vm1, %v3864_v49 }
  0x19   : > { %3054 = vmatprep.mubr.msk.bf16.mxu0 %vm346_vm0, %v317_v15  ;;  %v307_v25 = vld [vmem:[%s3932_s9 + $0xc0] sm:$0xff]  ;;  %v308_v26 = vld [vmem:[%s3932_s9 + $0xc8] sm:$0xff]  ;;  %v326_v28 = vpack.c.bf16 %v306_v22, %v305_v21  ;;  %v319_v29 = vpack.c.bf16 %v292_v24, %v291_v23  ;;  %v293_v31 = vld [vmem:[%s3932_s9 + $0x50] sm:$0xff]  ;;  %614 = vst.msk [vmem:[#allocation2 + $0xc0] sm:$0xff] %vm588_vm1, %v3864_v49 }
  0x1a   : > { %3070 = vmatprep.mubr.msk.bf16.mxu1 %vm346_vm0, %v325_v20  ;;  %v327_v30 = vpack.c.bf16 %v308_v26, %v307_v25  ;;  %v294_v32 = vld [vmem:[%s3932_s9 + $0x58] sm:$0xff]  ;;  %v309_v33 = vld [vmem:[%s3932_s9 + $0xd0] sm:$0xff]  ;;  %v295_v35 = vld [vmem:[%s3932_s9 + $0x60] sm:$0xff]  ;;  %615 = vst.msk [vmem:[#allocation2 + $0xc8] sm:$0xff] %vm588_vm1, %v3864_v49 }
  0x1b   : > { %v310_v34 = vld [vmem:[%s3932_s9 + $0xd8] sm:$0xff]  ;;  %v296_v36 = vld [vmem:[%s3932_s9 + $0x68] sm:$0xff]  ;;  %v311_v37 = vld [vmem:[%s3932_s9 + $0xe0] sm:$0xff]  ;;  %v320_v39 = vpack.c.bf16 %v294_v32, %v293_v31  ;;  %617 = vst.msk [vmem:[#allocation2 + $0xd8] sm:$0xff] %vm588_vm1, %v3864_v49 }
  0x1c   : > { %v312_v38 = vld [vmem:[%s3932_s9 + $0xe8] sm:$0xff]  ;;  %v328_v40 = vpack.c.bf16 %v310_v34, %v309_v33  ;;  %v321_v41 = vpack.c.bf16 %v296_v36, %v295_v35  ;;  %v297_v43 = vld [vmem:[%s3932_s9 + $0x70] sm:$0xff]  ;;  %v298_v44 = vld [vmem:[%s3932_s9 + $0x78] sm:$0xff]  ;;  %618 = vst.msk [vmem:[#allocation2 + $0xe0] sm:$0xff] %vm588_vm1, %v3864_v49 }
  0x1d   : > { %v329_v42 = vpack.c.bf16 %v312_v38, %v311_v37  ;;  %v313_v45 = vld [vmem:[%s3932_s9 + $0xf0] sm:$0xff]  ;;  %v314_v46 = vld [vmem:[%s3932_s9 + $0xf8] sm:$0xff]  ;;  %v322_v47 = vpack.c.bf16 %v298_v44, %v297_v43  ;;  %620 = vst.msk [vmem:[#allocation2 + $0xf0] sm:$0xff] %vm588_vm1, %v3864_v49  ;;  %621 = vst.msk [vmem:[#allocation2 + $0xf8] sm:$0xff] %vm588_vm1, %v3864_v49 }
  0x1e   : > { %v330_v48 = vpack.c.bf16 %v314_v46, %v313_v45  ;;  %623 = vst.msk [vmem:[#allocation2 + $0x108] sm:$0xff] %vm588_vm1, %v3864_v49  ;;  %624 = vst.msk [vmem:[#allocation2 + $0x110] sm:$0xff] %vm588_vm1, %v3864_v49  ;;  %v741_v50 = vld [vmem:[#allocation2 + $0x2] sm:$0xff] }
  0x1f   : > { %3055 = vmatmul.mubr.msk.bf16.gmra.mrb[4].mxu0 %vm346_vm0, %v318_v27  ;;  %626 = vst.msk [vmem:[#allocation2 + $0x120] sm:$0xff] %vm588_vm1, %v3864_v49  ;;  %627 = vst.msk [vmem:[#allocation2 + $0x128] sm:$0xff] %vm588_vm1, %v3864_v49  ;;  %v709_v52 = vld [vmem:[#allocation2 + $0x1] sm:$0xff] }
  0x20   : > { %3071 = vmatmul.mubr.msk.bf16.gmra.mrb[4].mxu1 %vm346_vm0, %v326_v28  ;;  %3058 = vmatprep.mubr.msk.bf16.mxu0 %vm346_vm0, %v319_v29  ;;  %629 = vst.msk [vmem:[#allocation2 + $0x138] sm:$0xff] %vm588_vm1, %v3864_v49  ;;  %630 = vst.msk [vmem:[#allocation2 + $0x140] sm:$0xff] %vm588_vm1, %v3864_v49 }
  0x21   : > { %3074 = vmatprep.mubr.msk.bf16.mxu1 %vm346_vm0, %v327_v30  ;;  %632 = vst.msk [vmem:[#allocation2 + $0x150] sm:$0xff] %vm588_vm1, %v3864_v49  ;;  %633 = vst.msk [vmem:[#allocation2 + $0x158] sm:$0xff] %vm588_vm1, %v3864_v49 }
  0x22   : > { %635 = vst.msk [vmem:[#allocation2 + $0x168] sm:$0xff] %vm588_vm1, %v3864_v49  ;;  %636 = vst.msk [vmem:[#allocation2 + $0x170] sm:$0xff] %vm588_vm1, %v3864_v49 }
  0x23   : > { %638 = vst.msk [vmem:[#allocation2 + $0x180] sm:$0xff] %vm588_vm1, %v3864_v49  ;;  %639 = vst.msk [vmem:[#allocation2 + $0x188] sm:$0xff] %vm588_vm1, %v3864_v49 }
  0x24   : > { %641 = vst.msk [vmem:[#allocation2 + $0x198] sm:$0xff] %vm588_vm1, %v3864_v49  ;;  %642 = vst.msk [vmem:[#allocation2 + $0x1a0] sm:$0xff] %vm588_vm1, %v3864_v49 }
  0x25   : > { %598 = vst.msk [vmem:[#allocation2 + $0x40] sm:$0x3] %vm591_vm2, %v3864_v49  ;;  %592 = vst.msk [vmem:[#allocation2 + $0x10] sm:$0x3] %vm591_vm2, %v3864_v49 }
  0x26   : > { %595 = vst.msk [vmem:[#allocation2 + $0x28] sm:$0x3] %vm591_vm2, %v3864_v49  ;;  %601 = vst.msk [vmem:[#allocation2 + $0x58] sm:$0x3] %vm591_vm2, %v3864_v49 }
  0x27   : > { %3059 = vmatmul.mubr.msk.bf16.gmra.mrb[8].mxu0 %vm346_vm0, %v320_v39  ;;  %604 = vst.msk [vmem:[#allocation2 + $0x70] sm:$0x3] %vm591_vm2, %v3864_v49  ;;  %607 = vst.msk [vmem:[#allocation2 + $0x88] sm:$0x3] %vm591_vm2, %v3864_v49 }
  0x28   : > { %3075 = vmatmul.mubr.msk.bf16.gmra.mrb[8].mxu1 %vm346_vm0, %v328_v40  ;;  %3062 = vmatprep.mubr.msk.bf16.mxu0 %vm346_vm0, %v321_v41  ;;  %610 = vst.msk [vmem:[#allocation2 + $0xa0] sm:$0x3] %vm591_vm2, %v3864_v49  ;;  %613 = vst.msk [vmem:[#allocation2 + $0xb8] sm:$0x3] %vm591_vm2, %v3864_v49 }
  0x29   : > { %3078 = vmatprep.mubr.msk.bf16.mxu1 %vm346_vm0, %v329_v42  ;;  %616 = vst.msk [vmem:[#allocation2 + $0xd0] sm:$0x3] %vm591_vm2, %v3864_v49  ;;  %619 = vst.msk [vmem:[#allocation2 + $0xe8] sm:$0x3] %vm591_vm2, %v3864_v49 }
  0x2a   : > { %622 = vst.msk [vmem:[#allocation2 + $0x100] sm:$0x3] %vm591_vm2, %v3864_v49  ;;  %625 = vst.msk [vmem:[#allocation2 + $0x118] sm:$0x3] %vm591_vm2, %v3864_v49 }
  0x2b   : > { %628 = vst.msk [vmem:[#allocation2 + $0x130] sm:$0x3] %vm591_vm2, %v3864_v49  ;;  %631 = vst.msk [vmem:[#allocation2 + $0x148] sm:$0x3] %vm591_vm2, %v3864_v49 }
  0x2c   : > { %634 = vst.msk [vmem:[#allocation2 + $0x160] sm:$0x3] %vm591_vm2, %v3864_v49  ;;  %637 = vst.msk [vmem:[#allocation2 + $0x178] sm:$0x3] %vm591_vm2, %v3864_v49  ;;  %v742_v51 = vld [vmem:[#allocation2 + $0xa] sm:$0xff] }
  0x2d   : > { %640 = vst.msk [vmem:[#allocation2 + $0x190] sm:$0x3] %vm591_vm2, %v3864_v49  ;;  %643 = vst.msk [vmem:[#allocation2 + $0x1a8] sm:$0x3] %vm591_vm2, %v3864_v49  ;;  %v3180_v53 = vpack.i.bf16 %v742_v51, %v741_v50  ;;  %v710_v54 = vld [vmem:[#allocation2 + $0x9] sm:$0xff] }
  0x2e   : > { %v3175_v55 = vpack.i.bf16 %v710_v54, %v709_v52 }
  0x2f   : > { %3063 = vmatmul.mubr.msk.bf16.gmra.mrb[12].mxu0 %vm346_vm0, %v322_v47  ;;  %3181 = vrot.lane.b32.xlu1 %v3180_v53, %s3865_s10 }
  0x30   : > { %3079 = vmatmul.mubr.msk.bf16.gmra.mrb[12].mxu1 %vm346_vm0, %v330_v48  ;;  %3176 = vrot.lane.b32.xlu0 %v3175_v55, %s3866_s11 }
  0xea   : > { %v3052_v57 = vpop.f32.mrb[0].mxu0 }
  0xeb   : > { %v438_v58 = vadd.f32 %v3052_v57, %v4041_v56  ;;  %v429_v59 = vpop.f32.mrb[1].mxu0  ;;  %v3068_v60 = vpop.f32.mrb[0].mxu1 }
  0xec   : > { %v430_v61 = vadd.f32 %v4041_v56, %v429_v59  ;;  %v3053_v62 = vpop.f32.mrb[2].mxu0  ;;  %v502_v63 = vadd.f32 %v3068_v60, %v4041_v56  ;;  %v493_v0 = vpop.f32.mrb[1].mxu1 }
  0xed   : > { %v558_v1 = vmax.f32 %v438_v58, 0.0  ;;  %v441_v2 = vadd.f32 %v3053_v62, %v4041_v56  ;;  %v432_v3 = vpop.f32.mrb[3].mxu0  ;;  %v494_v4 = vadd.f32 %v4041_v56, %v493_v0  ;;  %v3069_v5 = vpop.f32.mrb[2].mxu1 }
  0xee   : > { %v556_v6 = vmax.f32 %v430_v61, 0.0  ;;  %v433_v7 = vadd.f32 %v4041_v56, %v432_v3  ;;  %v574_v8 = vmax.f32 %v502_v63, 0.0  ;;  %v505_v9 = vadd.f32 %v3069_v5, %v4041_v56  ;;  %v496_v10 = vpop.f32.mrb[3].mxu1 }
  0xef   : > { %647 = vst.msk [vmem:[#allocation2 + $0x31] sm:$0xff] %vm588_vm1, %v558_v1  ;;  %v559_v11 = vmax.f32 %v441_v2, 0.0  ;;  %v572_v12 = vmax.f32 %v494_v4, 0.0  ;;  %v497_v13 = vadd.f32 %v4041_v56, %v496_v10 }
  0xf0   : > { %645 = vst.msk [vmem:[#allocation2 + $0x19] sm:$0xff] %vm588_vm1, %v556_v6  ;;  %v557_v14 = vmax.f32 %v433_v7, 0.0  ;;  %663 = vst.msk [vmem:[#allocation2 + $0xf1] sm:$0xff] %vm588_vm1, %v574_v8  ;;  %v575_v15 = vmax.f32 %v505_v9, 0.0 }
  0xf1   : > { %648 = vst.msk [vmem:[#allocation2 + $0x39] sm:$0xff] %vm588_vm1, %v559_v11  ;;  %661 = vst.msk [vmem:[#allocation2 + $0xd9] sm:$0xff] %vm588_vm1, %v572_v12  ;;  %v573_v16 = vmax.f32 %v497_v13, 0.0 }
  0xf2   : > { %646 = vst.msk [vmem:[#allocation2 + $0x21] sm:$0xff] %vm588_vm1, %v557_v14  ;;  %664 = vst.msk [vmem:[#allocation2 + $0xf9] sm:$0xff] %vm588_vm1, %v575_v15  ;;  %v3056_v17 = vpop.f32.mrb[4].mxu0 }
  0xf3   : > { %662 = vst.msk [vmem:[#allocation2 + $0xe1] sm:$0xff] %vm588_vm1, %v573_v16  ;;  %v454_v18 = vadd.f32 %v3056_v17, %v4041_v56  ;;  %v445_v19 = vpop.f32.mrb[5].mxu0  ;;  %v3072_v20 = vpop.f32.mrb[4].mxu1 }
  0xf4   : > { %v446_v21 = vadd.f32 %v4041_v56, %v445_v19  ;;  %v3057_v22 = vpop.f32.mrb[6].mxu0  ;;  %v518_v23 = vadd.f32 %v3072_v20, %v4041_v56  ;;  %v509_v24 = vpop.f32.mrb[5].mxu1 }
  0xf5   : > { %v562_v25 = vmax.f32 %v454_v18, 0.0  ;;  %v457_v26 = vadd.f32 %v3057_v22, %v4041_v56  ;;  %v448_v27 = vpop.f32.mrb[7].mxu0  ;;  %v510_v28 = vadd.f32 %v4041_v56, %v509_v24  ;;  %v3073_v29 = vpop.f32.mrb[6].mxu1 }
  0xf6   : > { %v560_v30 = vmax.f32 %v446_v21, 0.0  ;;  %v449_v31 = vadd.f32 %v4041_v56, %v448_v27  ;;  %v578_v32 = vmax.f32 %v518_v23, 0.0  ;;  %v521_v33 = vadd.f32 %v3073_v29, %v4041_v56  ;;  %v512_v34 = vpop.f32.mrb[7].mxu1  ;;  %v4068_v38 = vld [vmem:[#allocation2 + $0x30] sm:$0xff] }
  0xf7   : > { %651 = vst.msk [vmem:[#allocation2 + $0x61] sm:$0xff] %vm588_vm1, %v562_v25  ;;  %v563_v35 = vmax.f32 %v457_v26, 0.0  ;;  %v576_v36 = vmax.f32 %v510_v28, 0.0  ;;  %v513_v37 = vadd.f32 %v4041_v56, %v512_v34  ;;  %v902_v49 = vld [vmem:[#allocation2 + $0x31] sm:$0xff]  ;;  %v711_v23 = vld [vmem:[#allocation2 + $0x19] sm:$0xff] }
  0xf8   : > { %v4070_v39 = vld [vmem:[#allocation2 + $0x38] sm:$0xff]  ;;  %649 = vst.msk [vmem:[#allocation2 + $0x49] sm:$0xff] %vm588_vm1, %v560_v30  ;;  %v561_v40 = vmax.f32 %v449_v31, 0.0  ;;  %667 = vst.msk [vmem:[#allocation2 + $0x121] sm:$0xff] %vm588_vm1, %v578_v32  ;;  %v579_v41 = vmax.f32 %v521_v33, 0.0  ;;  %v886_v11 = vld [vmem:[#allocation2 + $0xf0] sm:$0xff] }
  0xf9   : > { %v3200_v42 = vpack.i.bf16 %v4070_v39, %v4068_v38  ;;  %652 = vst.msk [vmem:[#allocation2 + $0x69] sm:$0xff] %vm588_vm1, %v563_v35  ;;  %665 = vst.msk [vmem:[#allocation2 + $0x109] sm:$0xff] %vm588_vm1, %v576_v36  ;;  %v577_v43 = vmax.f32 %v513_v37, 0.0  ;;  %v903_v44 = vld [vmem:[#allocation2 + $0x39] sm:$0xff]  ;;  %v918_v14 = vld [vmem:[#allocation2 + $0xf1] sm:$0xff] }
  0xfa   : > { %650 = vst.msk [vmem:[#allocation2 + $0x51] sm:$0xff] %vm588_vm1, %v561_v40  ;;  %668 = vst.msk [vmem:[#allocation2 + $0x129] sm:$0xff] %vm588_vm1, %v579_v41  ;;  %v3060_v45 = vpop.f32.mrb[8].mxu0  ;;  %v3205_v54 = vpack.i.bf16 %v903_v44, %v902_v49  ;;  %v934_v60 = vld [vmem:[#allocation2 + $0x32] sm:$0xff]  ;;  %v935_v61 = vld [vmem:[#allocation2 + $0x3a] sm:$0xff] }
  0xfb   : > { %3201 = vrot.lane.b32.xlu0 %v3200_v42, %s3867_s14  ;;  %3186 = vrot.lane.b32.xlu1 %v3200_v42, %s3868_s15  ;;  %666 = vst.msk [vmem:[#allocation2 + $0x111] sm:$0xff] %vm588_vm1, %v577_v43  ;;  %v470_v46 = vadd.f32 %v3060_v45, %v4041_v56  ;;  %v461_v47 = vpop.f32.mrb[9].mxu0  ;;  %v3076_v48 = vpop.f32.mrb[8].mxu1  ;;  %v3210_v7 = vpack.i.bf16 %v935_v61, %v934_v60  ;;  %v4103_v12 = vld [vmem:[#allocation2 + $0xf8] sm:$0xff]  ;;  %v744_v21 = vld [vmem:[#allocation2 + $0x22] sm:$0xff] }
  0xfc   : > { %v462_v50 = vadd.f32 %v4041_v56, %v461_v47  ;;  %v3061_v51 = vpop.f32.mrb[10].mxu0  ;;  %v534_v52 = vadd.f32 %v3076_v48, %v4041_v56  ;;  %v525_v53 = vpop.f32.mrb[9].mxu1  ;;  %v3240_v13 = vpack.i.bf16 %v4103_v12, %v886_v11  ;;  %v919_v15 = vld [vmem:[#allocation2 + $0xf9] sm:$0xff]  ;;  %v712_v22 = vld [vmem:[#allocation2 + $0x21] sm:$0xff] }
  0xfd   : > { %v566_v55 = vmax.f32 %v470_v46, 0.0  ;;  %v473_v57 = vadd.f32 %v3061_v51, %v4041_v56  ;;  %v464_v58 = vpop.f32.mrb[11].mxu0  ;;  %v3077_v59 = vpop.f32.mrb[10].mxu1  ;;  %v526_v3 = vadd.f32 %v4041_v56, %v525_v53  ;;  %v3245_v16 = vpack.i.bf16 %v919_v15, %v918_v14  ;;  %v950_v17 = vld [vmem:[#allocation2 + $0xf2] sm:$0xff]  ;;  %v951_v18 = vld [vmem:[#allocation2 + $0xfa] sm:$0xff] }
  0xfe   : > { %v564_v62 = vmax.f32 %v462_v50, 0.0  ;;  %v465_v63 = vadd.f32 %v4041_v56, %v464_v58  ;;  %v582_v0 = vmax.f32 %v534_v52, 0.0  ;;  %v528_v1 = vpop.f32.mrb[11].mxu1  ;;  %v537_v4 = vadd.f32 %v3077_v59, %v4041_v56  ;;  %v743_v20 = vld [vmem:[#allocation2 + $0x1a] sm:$0xff]  ;;  %v760_v50 = vld [vmem:[#allocation2 + $0xe2] sm:$0xff] }
  0xff   : > { %3206 = vrot.lane.b32.xlu0 %v3205_v54, %s3869_s16  ;;  %3191 = vrot.lane.b32.xlu1 %v3205_v54, %s3870_s17  ;;  %655 = vst.msk [vmem:[#allocation2 + $0x91] sm:$0xff] %vm588_vm1, %v566_v55  ;;  %v567_v2 = vmax.f32 %v473_v57, 0.0  ;;  %v529_v6 = vadd.f32 %v4041_v56, %v528_v1  ;;  %v580_v8 = vmax.f32 %v526_v3, 0.0  ;;  %v3250_v19 = vpack.i.bf16 %v951_v18, %v950_v17  ;;  %v4117_v29 = vld [vmem:[#allocation2 + $0xd8] sm:$0xff]  ;;  %v4119_v30 = vld [vmem:[#allocation2 + $0xe0] sm:$0xff] }
 0x100   : > { %653 = vst.msk [vmem:[#allocation2 + $0x79] sm:$0xff] %vm588_vm1, %v564_v62  ;;  %v565_v5 = vmax.f32 %v465_v63, 0.0  ;;  %671 = vst.msk [vmem:[#allocation2 + $0x151] sm:$0xff] %vm588_vm1, %v582_v0  ;;  %v583_v9 = vmax.f32 %v537_v4, 0.0  ;;  %v3270_v25 = vpack.i.bf16 %v744_v21, %v743_v20  ;;  %v3265_v26 = vpack.i.bf16 %v712_v22, %v711_v23  ;;  %v4121_v31 = vld [vmem:[#allocation2 + $0x20] sm:$0xff]  ;;  %v4126_v34 = vld [vmem:[#allocation2 + $0x18] sm:$0xff] }
 0x101   : > { %656 = vst.msk [vmem:[#allocation2 + $0x99] sm:$0xff] %vm588_vm1, %v567_v2  ;;  %v581_v10 = vmax.f32 %v529_v6, 0.0  ;;  %669 = vst.msk [vmem:[#allocation2 + $0x139] sm:$0xff] %vm588_vm1, %v580_v8  ;;  %v3290_v36 = vpack.i.bf16 %v4119_v30, %v4117_v29  ;;  %v3275_v37 = vpack.i.bf16 %v4121_v31, %v4126_v34  ;;  %v916_v41 = vld [vmem:[#allocation2 + $0xd9] sm:$0xff]  ;;  %v917_v42 = vld [vmem:[#allocation2 + $0xe1] sm:$0xff] }
 0x102   : > { %654 = vst.msk [vmem:[#allocation2 + $0x81] sm:$0xff] %vm588_vm1, %v565_v5  ;;  %672 = vst.msk [vmem:[#allocation2 + $0x159] sm:$0xff] %vm588_vm1, %v583_v9  ;;  %v3064_v24 = vpop.f32.mrb[12].mxu0  ;;  %v3295_v47 = vpack.i.bf16 %v917_v42, %v916_v41  ;;  %v759_v49 = vld [vmem:[#allocation2 + $0xda] sm:$0xff]  ;;  %v4146_v52 = vld [vmem:[#allocation2 + $0x68] sm:$0xff] }
 0x103   : > { %3211 = vrot.lane.b32.xlu0 %v3210_v7, %s3871_s18  ;;  %3196 = vrot.lane.b32.xlu1 %v3210_v7, %s3872_s19  ;;  %670 = vst.msk [vmem:[#allocation2 + $0x141] sm:$0xff] %vm588_vm1, %v581_v10  ;;  %v486_v27 = vadd.f32 %v3064_v24, %v4041_v56  ;;  %v477_v28 = vpop.f32.mrb[13].mxu0  ;;  %v4144_v51 = vld [vmem:[#allocation2 + $0x60] sm:$0xff]  ;;  %v3310_v53 = vpack.i.bf16 %v760_v50, %v759_v49  ;;  %v812_v57 = vld [vmem:[#allocation2 + $0x69] sm:$0xff]  ;;  %v3080_v1 = vpop.f32.mrb[12].mxu1  ;;  %v921_v42 = vld [vmem:[#allocation2 + $0x111] sm:$0xff] }
 0x104   : > { %v478_v32 = vadd.f32 %v4041_v56, %v477_v28  ;;  %v3065_v40 = vpop.f32.mrb[14].mxu0  ;;  %v811_v55 = vld [vmem:[#allocation2 + $0x61] sm:$0xff]  ;;  %v844_v60 = vld [vmem:[#allocation2 + $0x6a] sm:$0xff]  ;;  %v550_v2 = vadd.f32 %v3080_v1, %v4041_v56  ;;  %v541_v3 = vpop.f32.mrb[13].mxu1 }
 0x105   : > { %v570_v33 = vmax.f32 %v486_v27, 0.0  ;;  %v489_v43 = vadd.f32 %v3065_v40, %v4041_v56  ;;  %v480_v44 = vpop.f32.mrb[15].mxu0  ;;  %v3335_v58 = vpack.i.bf16 %v812_v57, %v811_v55  ;;  %v843_v59 = vld [vmem:[#allocation2 + $0x62] sm:$0xff]  ;;  %v542_v6 = vadd.f32 %v4041_v56, %v541_v3  ;;  %v3081_v9 = vpop.f32.mrb[14].mxu1  ;;  %v860_v15 = vld [vmem:[#allocation2 + $0x12a] sm:$0xff] }
 0x106   : > { %v568_v35 = vmax.f32 %v478_v32, 0.0  ;;  %v481_v45 = vadd.f32 %v4041_v56, %v480_v44  ;;  %v3340_v61 = vpack.i.bf16 %v844_v60, %v843_v59  ;;  %v4158_v62 = vld [vmem:[#allocation2 + $0x120] sm:$0xff]  ;;  %v4160_v63 = vld [vmem:[#allocation2 + $0x128] sm:$0xff]  ;;  %v553_v11 = vadd.f32 %v3081_v9, %v4041_v56  ;;  %v873_v21 = vld [vmem:[#allocation2 + $0x50] sm:$0xff] }
 0x107   : > { %3221 = vrot.lane.b32.xlu0 %v3210_v7, %s3865_s10  ;;  %3216 = vrot.lane.b32.xlu1 %v3205_v54, %s3866_s11  ;;  %659 = vst.msk [vmem:[#allocation2 + $0xc1] sm:$0xff] %vm588_vm1, %v570_v33  ;;  %v571_v46 = vmax.f32 %v489_v43, 0.0  ;;  %v3330_v54 = vpack.i.bf16 %v4146_v52, %v4144_v51  ;;  %v3370_v0 = vpack.i.bf16 %v4160_v63, %v4158_v62  ;;  %v827_v4 = vld [vmem:[#allocation2 + $0x121] sm:$0xff]  ;;  %v828_v5 = vld [vmem:[#allocation2 + $0x129] sm:$0xff]  ;;  %v586_v7 = vmax.f32 %v550_v2, 0.0  ;;  %v748_v33 = vld [vmem:[#allocation2 + $0x52] sm:$0xff] }
 0x108   : > { %657 = vst.msk [vmem:[#allocation2 + $0xa9] sm:$0xff] %vm588_vm1, %v568_v35  ;;  %v569_v48 = vmax.f32 %v481_v45, 0.0  ;;  %v584_v8 = vmax.f32 %v542_v6, 0.0  ;;  %v3375_v10 = vpack.i.bf16 %v828_v5, %v827_v4  ;;  %v859_v14 = vld [vmem:[#allocation2 + $0x122] sm:$0xff]  ;;  %v587_v17 = vmax.f32 %v553_v11, 0.0  ;;  %v747_v32 = vld [vmem:[#allocation2 + $0x4a] sm:$0xff] }
 0x109   : > { %660 = vst.msk [vmem:[#allocation2 + $0xc9] sm:$0xff] %vm588_vm1, %v571_v46  ;;  %675 = vst.msk [vmem:[#allocation2 + $0x181] sm:$0xff] %vm588_vm1, %v586_v7  ;;  %v3816_v20 = vld [vmem:[%s5198_s3] sm:$0xff]   ;;  %v3817_v22 = vld [vmem:[%s5198_s3 + $0x8] sm:$0xff]   ;;  %v3430_v35 = vpack.i.bf16 %v748_v33, %v747_v32  ;;  %v4207_v46 = vpop.permute.xlu1 %3181 }
 0x10a   : > { %658 = vst.msk [vmem:[#allocation2 + $0xb1] sm:$0xff] %vm588_vm1, %v569_v48  ;;  %673 = vst.msk [vmem:[#allocation2 + $0x169] sm:$0xff] %vm588_vm1, %v584_v8  ;;  %3082 = vmatprep.subr.bf16.mxu1 %v3816_v20  ;;  %v904_v24 = vld [vmem:[#allocation2 + $0x49] sm:$0xff]  ;;  %v764_v45 = vld [vmem:[#allocation2 + $0x112] sm:$0xff] }
 0x10b   : > { %3241 = vrot.lane.b32.xlu0 %v3240_v13, %s3867_s14  ;;  %3226 = vrot.lane.b32.xlu1 %v3240_v13, %s3868_s15  ;;  %v544_v13 = vpop.f32.mrb[15].mxu1  ;;  %676 = vst.msk [vmem:[#allocation2 + $0x189] sm:$0xff] %vm588_vm1, %v587_v17  ;;  %v3818_v27 = vld [vmem:[%s5198_s3 + $0x10] ss:$0 sps:$4 sm:$0x33]   ;;  %v784_v49 = vld [vmem:[#allocation2 + $0x98] sm:$0xff] }
 0x10c   : > { %3083 = vmatpush3.bf16.msra.mxu1 %v3816_v20  ;;  %v2346_v28 = vsel %vm2344_vm3, %v3818_v27, 0  ;;  %v920_v41 = vld [vmem:[#allocation2 + $0x109] sm:$0xff]  ;;  %v815_v57 = vld [vmem:[#allocation2 + $0x91] sm:$0xff]  ;;  %v848_v1 = vld [vmem:[#allocation2 + $0x9a] sm:$0xff] }
 0x10d   : > { %3084 = vmatprep.subr.bf16.mxu1 %v3817_v22  ;;  %v3455_v43 = vpack.i.bf16 %v921_v42, %v920_v41  ;;  %v763_v44 = vld [vmem:[#allocation2 + $0x10a] sm:$0xff]  ;;  %v800_v6 = vld [vmem:[#allocation2 + $0x158] sm:$0xff] }
 0x10e   : > { %v783_v48 = vld [vmem:[#allocation2 + $0x90] sm:$0xff]  ;;  %v3470_v50 = vpack.i.bf16 %v764_v45, %v763_v44  ;;  %v678_v45 = vld [vmem:[#allocation2 + $0x8] sm:$0xff] }
 0x10f   : > { %3246 = vrot.lane.b32.xlu0 %v3245_v16, %s3869_s16  ;;  %3231 = vrot.lane.b32.xlu1 %v3245_v16, %s3870_s17  ;;  %v799_v5 = vld [vmem:[#allocation2 + $0x150] sm:$0xff] }
 0x110   : > { %3085 = vmatpush3.bf16.msra.mxu1 %v3817_v22  ;;  %v3530_v9 = vpack.i.bf16 %v800_v6, %v799_v5  ;;  %v876_v22 = vld [vmem:[#allocation2 + $0x78] sm:$0xff]  ;;  %v925_v6 = vld [vmem:[#allocation2 + $0x141] sm:$0xff] }
 0x111   : > { %3156 = vmatprep.subr.msk.bf16.mxu1 %vm2344_vm3, %v3818_v27  ;;  %v908_v27 = vld [vmem:[#allocation2 + $0x79] sm:$0xff] }
 0x112   : > { %v924_v5 = vld [vmem:[#allocation2 + $0x139] sm:$0xff] }
 0x113   : > { %3251 = vrot.lane.b32.xlu0 %v3250_v19, %s3871_s18  ;;  %3236 = vrot.lane.b32.xlu1 %v3250_v19, %s3872_s19 }
 0x114   : > { %3087 = vmatpush3.bf16.msra.mxu1 %v2346_v28  ;;  %v909_v28 = vld [vmem:[#allocation2 + $0x81] sm:$0xff] }
 0x117   : > { %3261 = vrot.lane.b32.xlu0 %v3250_v19, %s3865_s10  ;;  %3256 = vrot.lane.b32.xlu1 %v3245_v16, %s3866_s11  ;;  %v545_v16 = vadd.f32 %v4041_v56, %v544_v13  ;;  %v3380_v19 = vpack.i.bf16 %v860_v15, %v859_v14  ;;  %v872_v56 = vld [vmem:[#allocation2 + $0x48] sm:$0xff]  ;;  %v831_v13 = vld [vmem:[#allocation2 + $0x151] sm:$0xff]  ;;  %v832_v14 = vld [vmem:[#allocation2 + $0x159] sm:$0xff] }
 0x118   : > { %v3410_v23 = vpack.i.bf16 %v873_v21, %v872_v56  ;;  %v4247_v17 = vpack.i.bf16 %v832_v14, %v831_v13 }
 0x119   : > { %v585_v18 = vmax.f32 %v545_v16, 0.0 }
 0x11b   : > { %3271 = vrot.lane.b32.xlu1 %v3270_v25, %s3865_s10  ;;  %3266 = vrot.lane.b32.xlu0 %v3265_v26, %s3866_s11  ;;  %674 = vst.msk [vmem:[#allocation2 + $0x171] sm:$0xff] %vm588_vm1, %v585_v18  ;;  %v863_v18 = vld [vmem:[#allocation2 + $0x152] sm:$0xff] }
 0x11f   : > { %3291 = vrot.lane.b32.xlu1 %v3290_v36, %s3867_s14  ;;  %3276 = vrot.lane.b32.xlu0 %v3275_v37, %s3868_s15  ;;  %v889_v37 = vld [vmem:[#allocation2 + $0x110] sm:$0xff] }
 0x123   : > { %3296 = vrot.lane.b32.xlu1 %v3295_v47, %s3869_s16  ;;  %3281 = vrot.lane.b32.xlu0 %v3265_v26, %s3870_s17 }
 0x127   : > { %3306 = vrot.lane.b32.xlu1 %v3295_v47, %s3866_s11  ;;  %3286 = vrot.lane.b32.xlu0 %v3270_v25, %s3872_s19  ;;  %v905_v25 = vld [vmem:[#allocation2 + $0x51] sm:$0xff] }
 0x128   : > { %v3415_v26 = vpack.i.bf16 %v905_v25, %v904_v24 }
 0x12b   : > { %3311 = vrot.lane.b32.xlu1 %v3310_v53, %s3865_s10  ;;  %3301 = vrot.lane.b32.xlu0 %v3310_v53, %s3871_s18 }
 0x12f   : > { %3331 = vrot.lane.b32.xlu1 %v3330_v54, %s3868_s15  ;;  %3316 = vrot.lane.b32.xlu0 %v3290_v36, %s3868_s15  ;;  %v888_v36 = vld [vmem:[#allocation2 + $0x108] sm:$0xff] }
 0x130   : > { %v3450_v40 = vpack.i.bf16 %v889_v37, %v888_v36  ;;  %v940_v36 = vld [vmem:[#allocation2 + $0x7a] sm:$0xff]  ;;  %v941_v37 = vld [vmem:[#allocation2 + $0x82] sm:$0xff] }
 0x131   : > { %v3565_v44 = vpack.i.bf16 %v941_v37, %v940_v36 }
 0x133   : > { %3336 = vrot.lane.b32.xlu1 %v3335_v58, %s3870_s17  ;;  %3321 = vrot.lane.b32.xlu0 %v3295_v47, %s3870_s17  ;;  %v4209_v47 = vpop.permute.xlu0 %3176 }
 0x134   : > { %v3178_v41 = vunpack.i.l.bf16 %v4209_v47 }
 0x137   : > { %3341 = vrot.lane.b32.xlu1 %v3340_v61, %s3872_s19  ;;  %3326 = vrot.lane.b32.xlu0 %v3310_v53, %s3872_s19  ;;  %v3490_v53 = vpack.i.bf16 %v784_v49, %v783_v48  ;;  %v677_v48 = vld [vmem:[#allocation2] sm:$0xff]  ;;  %v3184_v49 = vunpack.i.h.bf16 %v4207_v46 }
 0x13b   : > { %3361 = vrot.lane.b32.xlu1 %v3335_v58, %s3866_s11  ;;  %3346 = vrot.lane.b32.xlu0 %v3330_v54, %s3867_s14 }
 0x13f   : > { %3371 = vrot.lane.b32.xlu1 %v3370_v0, %s3868_s15  ;;  %3351 = vrot.lane.b32.xlu0 %v3335_v58, %s3869_s16  ;;  %v816_v58 = vld [vmem:[#allocation2 + $0x99] sm:$0xff] }
 0x143   : > { %3376 = vrot.lane.b32.xlu1 %v3375_v10, %s3870_s17  ;;  %3356 = vrot.lane.b32.xlu0 %v3340_v61, %s3871_s18 }
 0x147   : > { %3381 = vrot.lane.b32.xlu1 %v3380_v19, %s3872_s19  ;;  %3366 = vrot.lane.b32.xlu0 %v3340_v61, %s3865_s10  ;;  %v3495_v61 = vpack.i.bf16 %v816_v58, %v815_v57  ;;  %v1990_v57 = vsel %vm588_vm1, %v677_v48, %v3178_v41 }
 0x14b   : > { %3401 = vrot.lane.b32.xlu1 %v3375_v10, %s3866_s11  ;;  %3386 = vrot.lane.b32.xlu0 %v3370_v0, %s3867_s14  ;;  %v847_v0 = vld [vmem:[#allocation2 + $0x92] sm:$0xff] }
 0x14c   : > { %v3500_v4 = vpack.i.bf16 %v848_v1, %v847_v0  ;;  %v893_v0 = vld [vmem:[#allocation2 + $0x140] sm:$0xff] }
 0x14f   : > { %3411 = vrot.lane.b32.xlu1 %v3410_v23, %s3867_s14  ;;  %3391 = vrot.lane.b32.xlu0 %v3375_v10, %s3869_s16 }
 0x153   : > { %3416 = vrot.lane.b32.xlu1 %v3415_v26, %s3869_s16  ;;  %3396 = vrot.lane.b32.xlu0 %v3380_v19, %s3871_s18 }
 0x157   : > { %3426 = vrot.lane.b32.xlu1 %v3415_v26, %s3866_s11  ;;  %3406 = vrot.lane.b32.xlu0 %v3380_v19, %s3865_s10  ;;  %v864_v19 = vld [vmem:[#allocation2 + $0x15a] sm:$0xff] }
 0x158   : > { %v4256_v21 = vpack.i.bf16 %v864_v19, %v863_v18 }
 0x15b   : > { %3431 = vrot.lane.b32.xlu1 %v3430_v35, %s3865_s10  ;;  %3421 = vrot.lane.b32.xlu0 %v3430_v35, %s3871_s18 }
 0x15f   : > { %3451 = vrot.lane.b32.xlu1 %v3450_v40, %s3867_s14  ;;  %3436 = vrot.lane.b32.xlu0 %v3410_v23, %s3868_s15  ;;  %v877_v23 = vld [vmem:[#allocation2 + $0x80] sm:$0xff] }
 0x163   : > { %3456 = vrot.lane.b32.xlu1 %v3455_v43, %s3869_s16  ;;  %3441 = vrot.lane.b32.xlu0 %v3415_v26, %s3870_s17  ;;  %v3555_v26 = vpack.i.bf16 %v877_v23, %v876_v22  ;;  %v3600_v23 = vpack.i.bf16 %v925_v6, %v924_v5 }
 0x167   : > { %3466 = vrot.lane.b32.xlu1 %v3455_v43, %s3866_s11  ;;  %3446 = vrot.lane.b32.xlu0 %v3430_v35, %s3872_s19  ;;  %v3560_v35 = vpack.i.bf16 %v909_v28, %v908_v27 }
 0x16b   : > { %3471 = vrot.lane.b32.xlu1 %v3470_v50, %s3865_s10  ;;  %3461 = vrot.lane.b32.xlu0 %v3470_v50, %s3871_s18 }
 0x16d   : > { %v4213_v54 = vpop.permute.xlu0 %3201  ;;  %v4215_v55 = vpop.permute.xlu1 %3186 }
 0x16f   : > { %3491 = vrot.lane.b32.xlu1 %v3490_v53, %s3868_s15  ;;  %3476 = vrot.lane.b32.xlu0 %v3450_v40, %s3868_s15  ;;  %v3179_v40 = vunpack.i.h.bf16 %v4209_v47 }
 0x171   : > { %v4219_v59 = vpop.permute.xlu0 %3206  ;;  %v4221_v60 = vpop.permute.xlu1 %3191 }
 0x173   : > { %3496 = vrot.lane.b32.xlu1 %v3495_v61, %s3870_s17  ;;  %3481 = vrot.lane.b32.xlu0 %v3455_v43, %s3870_s17 }
 0x175   : > { %v4225_v2 = vpop.permute.xlu0 %3211  ;;  %v4227_v3 = vpop.permute.xlu1 %3196 }
 0x177   : > { %3501 = vrot.lane.b32.xlu1 %v3500_v4, %s3872_s19  ;;  %3486 = vrot.lane.b32.xlu0 %v3470_v50, %s3872_s19  ;;  %v3183_v50 = vunpack.i.l.bf16 %v4207_v46 }
 0x179   : > { %v4231_v7 = vpop.permute.xlu0 %3221  ;;  %v4233_v8 = vpop.permute.xlu1 %3216  ;;  %v2023_v46 = vsel %vm2022_vm4, %v1990_v57, %v3183_v50  ;;  %v3208_v50 = vunpack.i.l.bf16 %v4219_v59 }
 0x17b   : > { %3521 = vrot.lane.b32.xlu1 %v3495_v61, %s3866_s11  ;;  %3506 = vrot.lane.b32.xlu0 %v3490_v53, %s3867_s14  ;;  %v1991_v53 = vsel %vm588_vm1, %v678_v45, %v3179_v40  ;;  %v3203_v40 = vunpack.i.l.bf16 %v4213_v54 }
 0x17c   : > { %v2024_v14 = vsel %vm2022_vm4, %v1991_v53, %v3184_v49  ;;  %v3209_v49 = vunpack.i.h.bf16 %v4219_v59 }
 0x17d   : > { %v4237_v10 = vpop.permute.xlu0 %3241  ;;  %v4239_v11 = vpop.permute.xlu1 %3226 }
 0x17e   : > { %5212 = vst [vmem:[#allocation3_spill] sm:$0xff] %v4237_v10 }
 0x17f   : > { %3531 = vrot.lane.b32.xlu1 %v3530_v9, %s3868_s15  ;;  %3511 = vrot.lane.b32.xlu0 %v3495_v61, %s3869_s16  ;;  %v892_v61 = vld [vmem:[#allocation2 + $0x138] sm:$0xff] }
 0x180   : > { %v3595_v18 = vpack.i.bf16 %v893_v0, %v892_v61  ;;  %v3213_v61 = vunpack.i.l.bf16 %v4225_v2 }
 0x181   : > { %v4243_v15 = vpop.permute.xlu0 %3246  ;;  %v4245_v16 = vpop.permute.xlu1 %3231 }
 0x182   : > { %5213 = vst [vmem:[#allocation4_spill] sm:$0xff] %v4243_v15  ;;  %v961_v15 = vld [vmem:[#allocation2 + $0x172] sm:$0xff] }
 0x183   : > { %3536 = vrot.lane.b32.xlu1 %v4247_v17, %s3870_s17  ;;  %3516 = vrot.lane.b32.xlu0 %v3500_v4, %s3871_s18 }
 0x185   : > { %v4252_v20 = vpop.permute.xlu0 %3251  ;;  %v4254_v56 = vpop.permute.xlu1 %3236 }
 0x186   : > { %5214 = vst [vmem:[#allocation5_spill] sm:$0xff] %v4252_v20  ;;  %v3218_v20 = vunpack.i.l.bf16 %v4233_v8 }
 0x187   : > { %3541 = vrot.lane.b32.xlu1 %v4256_v21, %s3872_s19  ;;  %3526 = vrot.lane.b32.xlu0 %v3500_v4, %s3865_s10 }
 0x189   : > { %v4261_v24 = vpop.permute.xlu0 %3261  ;;  %v4263_v25 = vpop.permute.xlu1 %3256 }
 0x18b   : > { %3556 = vrot.lane.b32.xlu1 %v3555_v26, %s3867_s14  ;;  %3546 = vrot.lane.b32.xlu0 %v3530_v9, %s3867_s14 }
 0x18d   : > { %v4267_v32 = vpop.permute.xlu1 %3271  ;;  %v4269_v33 = vpop.permute.xlu0 %3266 }
 0x18f   : > { %3561 = vrot.lane.b32.xlu1 %v3560_v35, %s3869_s16  ;;  %3551 = vrot.lane.b32.xlu0 %v4247_v17, %s3869_s16 }
 0x191   : > { %v4276_v42 = vpop.permute.xlu1 %3291  ;;  %v3277_v43 = vpop.permute.xlu0 %3276 }
 0x192   : > { %5215 = vst [vmem:[#allocation6_spill] sm:$0xff] %v4276_v42  ;;  %v3279_v1 = vunpack.i.h.bf16 %v3277_v43  ;;  %v3278_v4 = vunpack.i.l.bf16 %v3277_v43  ;;  %v3219_v42 = vunpack.i.h.bf16 %v4233_v8 }
 0x193   : > { %3571 = vrot.lane.b32.xlu1 %v3560_v35, %s3866_s11  ;;  %3566 = vrot.lane.b32.xlu0 %v3565_v44, %s3871_s18 }
 0x194   : > { %v2057_v27 = vsel %vm2055_vm5, %v2024_v14, %v3279_v1  ;;  %v2056_v28 = vsel %vm2055_vm5, %v2023_v46, %v3278_v4  ;;  %v956_v1 = vld [vmem:[#allocation2 + $0x13a] sm:$0xff]  ;;  %v957_v4 = vld [vmem:[#allocation2 + $0x142] sm:$0xff] }
 0x195   : > { %v4284_v47 = vpop.permute.xlu1 %3296  ;;  %v3282_v58 = vpop.permute.xlu0 %3281  ;;  %v3605_v46 = vpack.i.bf16 %v957_v4, %v956_v1  ;;  %v788_v14 = vld [vmem:[#allocation2 + $0xc8] sm:$0xff]  ;;  %v3269_v1 = vunpack.i.h.bf16 %v4269_v33  ;;  %v3268_v4 = vunpack.i.l.bf16 %v4269_v33  ;;  %v3273_v33 = vunpack.i.l.bf16 %v4267_v32 }
 0x196   : > { %5216 = vst [vmem:[#allocation7_spill] sm:$0xff] %v4284_v47  ;;  %v3284_v9 = vunpack.i.h.bf16 %v3282_v58  ;;  %v3283_v13 = vunpack.i.l.bf16 %v3282_v58 }
 0x197   : > { %3576 = vrot.lane.b32.xlu1 %v3565_v44, %s3865_s10  ;;  %3581 = vrot.lane.b32.xlu0 %v3555_v26, %s3868_s15  ;;  %v3204_v26 = vunpack.i.h.bf16 %v4213_v54  ;;  %v1993_v47 = vsel %vm588_vm1, %v4121_v31, %v3269_v1 }
 0x198   : > { %v2088_v41 = vsel %vm346_vm0, %v2056_v28, %v3283_v13  ;;  %v2089_v43 = vsel %vm346_vm0, %v2057_v27, %v3284_v9 }
 0x199   : > { %v4290_v19 = vpop.permute.xlu1 %3306  ;;  %v3287_v22 = vpop.permute.xlu0 %3286 }
 0x19a   : > { %v3289_v36 = vunpack.i.h.bf16 %v3287_v22  ;;  %v3288_v37 = vunpack.i.l.bf16 %v3287_v22 }
 0x19b   : > { %3596 = vrot.lane.b32.xlu1 %v3595_v18, %s3867_s14  ;;  %3586 = vrot.lane.b32.xlu0 %v3560_v35, %s3870_s17  ;;  %v3214_v35 = vunpack.i.h.bf16 %v4225_v2 }
 0x19c   : > { %v2121_v45 = vsel %vm2120_vm6, %v2088_v41, %v3288_v37  ;;  %v2122_v48 = vsel %vm2120_vm6, %v2089_v43, %v3289_v36 }
 0x19d   : > { %v2154_v54 = vsel %vm2153_vm7, %v2121_v45, %v3203_v40  ;;  %v2155_v53 = vsel %vm2153_vm7, %v2122_v48, %v3204_v26  ;;  %v4306_v57 = vpop.permute.xlu1 %3311  ;;  %v4308_v58 = vpop.permute.xlu0 %3301  ;;  %v819_v26 = vld [vmem:[#allocation2 + $0xc1] sm:$0xff]  ;;  %v820_v40 = vld [vmem:[#allocation2 + $0xc9] sm:$0xff] }
 0x19e   : > { %5217 = vst [vmem:[#allocation8_spill] sm:$0xff] %v4308_v58  ;;  %v2187_v0 = vsel %vm2186_vm8, %v2154_v54, %v3208_v50  ;;  %v2188_v59 = vsel %vm2186_vm8, %v2155_v53, %v3209_v49  ;;  %v3640_v45 = vpack.i.bf16 %v820_v40, %v819_v26  ;;  %v851_v48 = vld [vmem:[#allocation2 + $0xc2] sm:$0xff]  ;;  %v852_v49 = vld [vmem:[#allocation2 + $0xca] sm:$0xff] }
 0x19f   : > { %3601 = vrot.lane.b32.xlu1 %v3600_v23, %s3869_s16  ;;  %3591 = vrot.lane.b32.xlu0 %v3565_v44, %s3872_s19  ;;  %v2220_v5 = vsel %vm2219_vm9, %v2187_v0, %v3213_v61  ;;  %v2221_v6 = vsel %vm2219_vm9, %v2188_v59, %v3214_v35  ;;  %v787_v44 = vld [vmem:[#allocation2 + $0xc0] sm:$0xff]  ;;  %v4345_v54 = vpack.i.bf16 %v852_v49, %v851_v48  ;;  %v880_v35 = vld [vmem:[#allocation2 + $0xa8] sm:$0xff]  ;;  %v881_v61 = vld [vmem:[#allocation2 + $0xb0] sm:$0xff] }
 0x1a0   : > { %v2252_v2 = vpack.c.bf16 %v2221_v6, %v2220_v5  ;;  %v3635_v28 = vpack.i.bf16 %v788_v14, %v787_v44  ;;  %v912_v5 = vld [vmem:[#allocation2 + $0xa9] sm:$0xff]  ;;  %v913_v6 = vld [vmem:[#allocation2 + $0xb1] sm:$0xff]  ;;  %v4360_v44 = vpack.i.bf16 %v881_v61, %v880_v35  ;;  %v803_v26 = vld [vmem:[#allocation2 + $0x180] sm:$0xff] }
 0x1a1   : > { %v4318_v9 = vpop.permute.xlu1 %3331  ;;  %v4320_v13 = vpop.permute.xlu0 %3316  ;;  %v944_v14 = vld [vmem:[#allocation2 + $0xaa] sm:$0xff]  ;;  %v835_v49 = vld [vmem:[#allocation2 + $0x181] sm:$0xff]  ;;  %v4388_v31 = vpack.i.bf16 %v913_v6, %v912_v5 }
 0x1a2   : > { %5218 = vst [vmem:[#allocation9_spill] sm:$0xff] %v4320_v13  ;;  %3088 = vmatprep.mubr.msk.bf16.mxu1 %vm2295_vm10, %v2252_v2  ;;  %v804_v48 = vld [vmem:[#allocation2 + $0x188] sm:$0xff]  ;;  %v4404_v5 = vld [vmem:[#allocation2 + $0x1a0] sm:$0xff] }
 0x1a3   : > { %3611 = vrot.lane.b32.xlu1 %v3600_v23, %s3866_s11  ;;  %3606 = vrot.lane.b32.xlu0 %v3605_v46, %s3871_s18  ;;  %v836_v58 = vld [vmem:[#allocation2 + $0x189] sm:$0xff] }
 0x1a4   : > { %v867_v35 = vld [vmem:[#allocation2 + $0x182] sm:$0xff]  ;;  %v868_v61 = vld [vmem:[#allocation2 + $0x18a] sm:$0xff] }
 0x1a5   : > { %v4325_v22 = vpop.permute.xlu1 %3336  ;;  %v4327_v27 = vpop.permute.xlu0 %3321  ;;  %v896_v13 = vld [vmem:[#allocation2 + $0x168] sm:$0xff] }
 0x1a6   : > { %5219 = vst [vmem:[#allocation10_spill] sm:$0xff] %v4327_v27 }
 0x1a7   : > { %3616 = vrot.lane.b32.xlu1 %v3605_v46, %s3865_s10  ;;  %3621 = vrot.lane.b32.xlu0 %v3595_v18, %s3868_s15 }
 0x1a9   : > { %v4331_v36 = vpop.permute.xlu1 %3341  ;;  %v4333_v37 = vpop.permute.xlu0 %3326 }
 0x1aa   : > { %5220 = vst [vmem:[#allocation11_spill] sm:$0xff] %v4333_v37  ;;  %v3274_v37 = vunpack.i.h.bf16 %v4267_v32 }
 0x1ab   : > { %3636 = vrot.lane.b32.xlu1 %v3635_v28, %s3868_s15  ;;  %3626 = vrot.lane.b32.xlu0 %v3600_v23, %s3870_s17 }
 0x1ac   : > { %v2026_v8 = vsel %vm2022_vm4, %v1993_v47, %v3274_v37  ;;  %v1994_v47 = vsel %vm588_vm1, %v4068_v38, %v3218_v20  ;;  %v3308_v37 = vunpack.i.l.bf16 %v4290_v19  ;;  %v3194_v38 = vunpack.i.h.bf16 %v4221_v60 }
 0x1ad   : > { %v3362_v41 = vpop.permute.xlu1 %3361  ;;  %v4337_v43 = vpop.permute.xlu0 %3346  ;;  %v3199_v20 = vunpack.i.h.bf16 %v4227_v3 }
 0x1ae   : > { %v3364_v0 = vunpack.i.h.bf16 %v3362_v41  ;;  %v3363_v59 = vunpack.i.l.bf16 %v3362_v41 }
 0x1af   : > { %3641 = vrot.lane.b32.xlu1 %v3640_v45, %s3870_s17  ;;  %3631 = vrot.lane.b32.xlu0 %v3605_v46, %s3872_s19 }
 0x1b0   : > { %v1998_v27 = vsel %vm588_vm1, %v4144_v51, %v3363_v59  ;;  %v897_v51 = vld [vmem:[#allocation2 + $0x170] sm:$0xff] }
 0x1b1   : > { %v4341_v18 = vpop.permute.xlu1 %3371  ;;  %v4343_v50 = vpop.permute.xlu0 %3351  ;;  %v929_v59 = vld [vmem:[#allocation2 + $0x171] sm:$0xff]  ;;  %v4406_v6 = vpack.i.bf16 %v897_v51, %v896_v13  ;;  %v1995_v13 = vsel %vm588_vm1, %v4070_v39, %v3219_v42  ;;  %v3193_v39 = vunpack.i.l.bf16 %v4221_v60  ;;  %v3198_v42 = vunpack.i.l.bf16 %v4227_v3 }
 0x1b2   : > { %v2008_v60 = vsel %vm588_vm1, %v4117_v29, %v3308_v37  ;;  %v3314_v3 = vunpack.i.h.bf16 %v4306_v57  ;;  %v3233_v29 = vunpack.i.l.bf16 %v4245_v16 }
 0x1b3   : > { %3646 = vrot.lane.b32.xlu1 %v4345_v54, %s3872_s19  ;;  %3651 = vrot.lane.b32.xlu0 %v3635_v28, %s3867_s14  ;;  %v945_v28 = vld [vmem:[#allocation2 + $0xb2] sm:$0xff] }
 0x1b4   : > { %v4390_v1 = vpack.i.bf16 %v945_v28, %v944_v14  ;;  %v3188_v28 = vunpack.i.l.bf16 %v4215_v55 }
 0x1b5   : > { %v4350_v23 = vpop.permute.xlu1 %3376  ;;  %v4352_v53 = vpop.permute.xlu0 %3356 }
 0x1b7   : > { %3666 = vrot.lane.b32.xlu1 %v3640_v45, %s3866_s11  ;;  %3656 = vrot.lane.b32.xlu0 %v3640_v45, %s3869_s16  ;;  %v1999_v45 = vsel %vm588_vm1, %v4146_v52, %v3364_v0  ;;  %v928_v0 = vld [vmem:[#allocation2 + $0x169] sm:$0xff] }
 0x1b8   : > { %v4408_v14 = vpack.i.bf16 %v929_v59, %v928_v0 }
 0x1b9   : > { %v4358_v2 = vpop.permute.xlu1 %3381  ;;  %v3367_v46 = vpop.permute.xlu0 %3366 }
 0x1ba   : > { %v3369_v40 = vunpack.i.h.bf16 %v3367_v46  ;;  %v3368_v41 = vunpack.i.l.bf16 %v3367_v46  ;;  %v1992_v46 = vsel %vm588_vm1, %v4126_v34, %v3268_v4 }
 0x1bb   : > { %3676 = vrot.lane.b32.xlu1 %v4360_v44, %s3867_s14  ;;  %3661 = vrot.lane.b32.xlu0 %v4345_v54, %s3871_s18  ;;  %v2025_v10 = vsel %vm2022_vm4, %v1992_v46, %v3273_v33 }
 0x1bc   : > { %v4375_v32 = vsel %vm2022_vm4, %v1999_v45, %v3369_v40  ;;  %v4378_v52 = vsel %vm2022_vm4, %v1998_v27, %v3368_v41  ;;  %v4392_v27 = vpack.i.bf16 %v804_v48, %v803_v26  ;;  %v4394_v40 = vpack.i.bf16 %v836_v58, %v835_v49  ;;  %v960_v45 = vld [vmem:[#allocation2 + $0x16a] sm:$0xff] }
 0x1bd   : > { %5221 = vst [vmem:[#allocation12_spill] sm:$0xff] %v4375_v32  ;;  %v4384_v34 = vpop.permute.xlu1 %3401  ;;  %v4386_v4 = vpop.permute.xlu0 %3386  ;;  %v4396_v41 = vpack.i.bf16 %v868_v61, %v867_v35  ;;  %v4402_v32 = vld [vmem:[#allocation2 + $0x198] sm:$0xff]  ;;  %v3189_v58 = vunpack.i.h.bf16 %v4215_v55  ;;  %v3224_v26 = vunpack.i.h.bf16 %v4231_v7  ;;  %v3223_v48 = vunpack.i.l.bf16 %v4231_v7 }
 0x1be   : > { %v4423_v35 = vpack.i.bf16 %v961_v15, %v960_v45  ;;  %v2058_v55 = vsel %vm2055_vm5, %v2025_v10, %v3188_v28  ;;  %v3313_v61 = vunpack.i.l.bf16 %v4306_v57  ;;  %v3229_v10 = vunpack.i.h.bf16 %v4239_v11 }
 0x1bf   : > { %3681 = vrot.lane.b32.xlu1 %v4388_v31, %s3869_s16  ;;  %3671 = vrot.lane.b32.xlu0 %v4345_v54, %s3865_s10  ;;  %v2059_v7 = vsel %vm2055_vm5, %v2026_v8, %v3189_v58  ;;  %v3750_v54 = vpack.i.bf16 %v4404_v5, %v4402_v32  ;;  %v3309_v15 = vunpack.i.h.bf16 %v4290_v19  ;;  %v4441_v46 = vsel %vm2022_vm4, %v1994_v47, %v3223_v48 }
 0x1c0   : > { %v4444_v51 = vsel %vm2022_vm4, %v1995_v13, %v3224_v26  ;;  %v2090_v0 = vsel %vm346_vm0, %v2058_v55, %v3193_v39  ;;  %v2091_v59 = vsel %vm346_vm0, %v2059_v7, %v3194_v38  ;;  %v3228_v8 = vunpack.i.l.bf16 %v4239_v11 }
 0x1c1   : > { %v3412_v49 = vpop.permute.xlu1 %3411  ;;  %v4421_v33 = vpop.permute.xlu0 %3391  ;;  %v2041_v58 = vsel %vm2022_vm4, %v2008_v60, %v3313_v61  ;;  %v3404_v28 = vunpack.i.h.bf16 %v4384_v34  ;;  %v3403_v26 = vunpack.i.l.bf16 %v4384_v34  ;;  %v3234_v48 = vunpack.i.h.bf16 %v4245_v16 }
 0x1c2   : > { %v3239_v57 = vunpack.i.h.bf16 %v4254_v56  ;;  %v3238_v47 = vunpack.i.l.bf16 %v4254_v56  ;;  %v3259_v13 = vunpack.i.h.bf16 %v4263_v25  ;;  %v2009_v11 = vsel %vm588_vm1, %v4119_v30, %v3309_v15 }
 0x1c3   : > { %3691 = vrot.lane.b32.xlu1 %v4388_v31, %s3866_s11  ;;  %3686 = vrot.lane.b32.xlu0 %v4390_v1, %s3871_s18  ;;  %v2123_v37 = vsel %vm2120_vm6, %v2090_v0, %v3198_v42  ;;  %v2124_v34 = vsel %vm2120_vm6, %v2091_v59, %v3199_v20  ;;  %v2042_v16 = vsel %vm2022_vm4, %v2009_v11, %v3314_v3  ;;  %v3414_v7 = vunpack.i.h.bf16 %v3412_v49  ;;  %v684_v11 = vld [vmem:[#allocation2 + $0x50] sm:$0xff] }
 0x1c4   : > { %v2074_v55 = vsel %vm2055_vm5, %v2041_v58, %v3228_v8  ;;  %v3413_v61 = vunpack.i.l.bf16 %v3412_v49  ;;  %v2015_v60 = vsel %vm588_vm1, %v4160_v63, %v3404_v28  ;;  %v2014_v30 = vsel %vm588_vm1, %v4158_v62, %v3403_v26  ;;  %v683_v26 = vld [vmem:[#allocation2 + $0x48] sm:$0xff] }
 0x1c5   : > { %v3417_v45 = vpop.permute.xlu1 %3416  ;;  %v4451_v19 = vpop.permute.xlu0 %3396  ;;  %v2075_v3 = vsel %vm2055_vm5, %v2042_v16, %v3229_v10  ;;  %v3334_v49 = vunpack.i.h.bf16 %v4318_v9  ;;  %v3333_v62 = vunpack.i.l.bf16 %v4318_v9 }
 0x1c6   : > { %v3419_v20 = vunpack.i.h.bf16 %v3417_v45  ;;  %v3418_v0 = vunpack.i.l.bf16 %v3417_v45  ;;  %v3339_v45 = vunpack.i.h.bf16 %v4325_v22  ;;  %v2156_v58 = vsel %vm2153_vm7, %v2123_v37, %v3413_v61 }
 0x1c7   : > { %3696 = vrot.lane.b32.xlu1 %v4390_v1, %s3865_s10  ;;  %3701 = vrot.lane.b32.xlu0 %v4360_v44, %s3868_s15 }
 0x1c9   : > { %v3427_v38 = vpop.permute.xlu1 %3426  ;;  %v3407_v39 = vpop.permute.xlu0 %3406 }
 0x1ca   : > { %v3409_v42 = vunpack.i.h.bf16 %v3407_v39  ;;  %v3408_v15 = vunpack.i.l.bf16 %v3407_v39  ;;  %v3429_v59 = vunpack.i.h.bf16 %v3427_v38  ;;  %v3428_v44 = vunpack.i.l.bf16 %v3427_v38 }
 0x1cb   : > { %3721 = vrot.lane.b32.xlu1 %v4247_v17, %s3866_s11  ;;  %3706 = vrot.lane.b32.xlu0 %v4388_v31, %s3870_s17  ;;  %v2157_v17 = vsel %vm2153_vm7, %v2124_v34, %v3414_v7 }
 0x1cc   : > { %v4481_v8 = vsel %vm2022_vm4, %v2015_v60, %v3409_v42  ;;  %v4484_v63 = vsel %vm2022_vm4, %v2014_v30, %v3408_v15  ;;  %v2189_v30 = vsel %vm2186_vm8, %v2156_v58, %v3418_v0  ;;  %v2190_v31 = vsel %vm2186_vm8, %v2157_v17, %v3419_v20 }
 0x1cd   : > { %v3432_v10 = vpop.permute.xlu1 %3431  ;;  %v3422_v28 = vpop.permute.xlu0 %3421  ;;  %v1997_v9 = vsel %vm588_vm1, %v684_v11, %v3429_v59  ;;  %v1996_v42 = vsel %vm588_vm1, %v683_v26, %v3428_v44  ;;  %v3338_v15 = vunpack.i.l.bf16 %v4325_v22  ;;  %v3344_v17 = vunpack.i.h.bf16 %v4331_v36 }
 0x1ce   : > { %v3434_v16 = vunpack.i.h.bf16 %v3432_v10  ;;  %v3433_v38 = vunpack.i.l.bf16 %v3432_v10  ;;  %v3424_v39 = vunpack.i.h.bf16 %v3422_v28  ;;  %v3423_v60 = vunpack.i.l.bf16 %v3422_v28 }
 0x1cf   : > { %3731 = vrot.lane.b32.xlu1 %v4392_v27, %s3868_s15  ;;  %3711 = vrot.lane.b32.xlu0 %v4390_v1, %s3872_s19  ;;  %v3343_v10 = vunpack.i.l.bf16 %v4331_v36  ;;  %v2106_v28 = vsel %vm346_vm0, %v2074_v55, %v3233_v29  ;;  %v2107_v26 = vsel %vm346_vm0, %v2075_v3, %v3234_v48  ;;  %v4522_v36 = vsel %vm588_vm1, %v4103_v12, %v3259_v13 }
 0x1d0   : > { %v2029_v37 = vsel %vm2022_vm4, %v1996_v42, %v3433_v38  ;;  %v2030_v34 = vsel %vm2022_vm4, %v1997_v9, %v3434_v16  ;;  %v2222_v7 = vsel %vm2219_vm9, %v2189_v30, %v3423_v60  ;;  %v2223_v61 = vsel %vm2219_vm9, %v2190_v31, %v3424_v39 }
 0x1d1   : > { %v2062_v20 = vsel %vm2055_vm5, %v2029_v37, %v3333_v62  ;;  %v2063_v0 = vsel %vm2055_vm5, %v2030_v34, %v3334_v49  ;;  %v2253_v59 = vpack.c.bf16 %v2223_v61, %v2222_v7  ;;  %v3452_v44 = vpop.permute.xlu1 %3451  ;;  %v3437_v58 = vpop.permute.xlu0 %3436  ;;  %v3264_v49 = vunpack.i.h.bf16 %v4261_v24 }
 0x1d2   : > { %v3454_v11 = vunpack.i.h.bf16 %v3452_v44  ;;  %v3453_v16 = vunpack.i.l.bf16 %v3452_v44  ;;  %v2094_v22 = vsel %vm346_vm0, %v2062_v20, %v3338_v15  ;;  %v2095_v1 = vsel %vm346_vm0, %v2063_v0, %v3339_v45 }
 0x1d3   : > { %3736 = vrot.lane.b32.xlu1 %v4394_v40, %s3870_s17  ;;  %3089 = vmatmul.mubr.msk.bf16.vlgmr.msra.gmra.mrb[16].mxu1 %vm2295_vm10, %v2253_v59  ;;  %v3263_v62 = vunpack.i.l.bf16 %v4261_v24  ;;  %v3258_v48 = vunpack.i.l.bf16 %v4263_v25  ;;  %v2139_v29 = vsel %vm2120_vm6, %v2106_v28, %v3238_v47  ;;  %v2140_v55 = vsel %vm2120_vm6, %v2107_v26, %v3239_v57  ;;  %v932_v24 = vld [vmem:[#allocation2 + $0x199] sm:$0xff] }
 0x1d4   : > { %3716 = vrot.lane.b32.xlu0 %v4256_v21, %s3871_s18  ;;  %v4534_v38 = vsel %vm2120_vm6, %v2094_v22, %v3343_v10  ;;  %v4537_v12 = vsel %vm2120_vm6, %v2095_v1, %v3344_v17  ;;  %v3439_v13 = vunpack.i.h.bf16 %v3437_v58  ;;  %v3438_v39 = vunpack.i.l.bf16 %v3437_v58  ;;  %v699_v1 = vld [vmem:[#allocation2 + $0x108] sm:$0xff] }
 0x1d5   : > { %v3457_v3 = vpop.permute.xlu1 %3456  ;;  %v3442_v45 = vpop.permute.xlu0 %3441  ;;  %v2172_v31 = vsel %vm2153_vm7, %v2139_v29, %v3453_v16  ;;  %v2173_v47 = vsel %vm2153_vm7, %v2140_v55, %v3454_v11  ;;  %v3349_v57 = vunpack.i.h.bf16 %v4337_v43  ;;  %v3348_v42 = vunpack.i.l.bf16 %v4337_v43  ;;  %v700_v29 = vld [vmem:[#allocation2 + $0x110] sm:$0xff] }
 0x1d6   : > { %v3459_v60 = vunpack.i.h.bf16 %v3457_v3  ;;  %v3458_v30 = vunpack.i.l.bf16 %v3457_v3  ;;  %v3444_v9 = vunpack.i.h.bf16 %v3442_v45  ;;  %v3443_v56 = vunpack.i.l.bf16 %v3442_v45 }
 0x1d7   : > { %3741 = vrot.lane.b32.xlu1 %v4396_v41, %s3872_s19  ;;  %v3374_v7 = vunpack.i.h.bf16 %v4341_v18  ;;  %v3373_v61 = vunpack.i.l.bf16 %v4341_v18  ;;  %v3354_v15 = vunpack.i.h.bf16 %v4343_v50  ;;  %v3353_v20 = vunpack.i.l.bf16 %v4343_v50 }
 0x1d8   : > { %v2205_v37 = vsel %vm2186_vm8, %v2172_v31, %v3458_v30  ;;  %v2206_v34 = vsel %vm2186_vm8, %v2173_v47, %v3459_v60  ;;  %3726 = vrot.lane.b32.xlu0 %v4256_v21, %s3865_s10  ;;  %v2061_v43 = vsel %vm2055_vm5, %v4444_v51, %v3439_v13  ;;  %v2060_v44 = vsel %vm2055_vm5, %v4441_v46, %v3438_v39 }
 0x1d9   : > { %v3467_v0 = vpop.permute.xlu1 %3466  ;;  %v3447_v59 = vpop.permute.xlu0 %3446  ;;  %v2092_v21 = vsel %vm346_vm0, %v2060_v44, %v3443_v56  ;;  %v2093_v10 = vsel %vm346_vm0, %v2061_v43, %v3444_v9  ;;  %v3379_v50 = vunpack.i.h.bf16 %v4350_v23  ;;  %v3378_v51 = vunpack.i.l.bf16 %v4350_v23 }
 0x1da   : > { %v3449_v58 = vunpack.i.h.bf16 %v3447_v59  ;;  %v3448_v17 = vunpack.i.l.bf16 %v3447_v59  ;;  %v3469_v28 = vunpack.i.h.bf16 %v3467_v0  ;;  %v3468_v18 = vunpack.i.l.bf16 %v3467_v0 }
 0x1db   : > { %3751 = vrot.lane.b32.xlu1 %v3750_v54, %s3867_s14  ;;  %v3359_v11 = vunpack.i.h.bf16 %v4352_v53  ;;  %v3358_v16 = vunpack.i.l.bf16 %v4352_v53  ;;  %v3384_v0 = vunpack.i.h.bf16 %v4358_v2 }
 0x1dc   : > { %v2125_v26 = vsel %vm2120_vm6, %v2092_v21, %v3448_v17  ;;  %v2126_v46 = vsel %vm2120_vm6, %v2093_v10, %v3449_v58  ;;  %3746 = vrot.lane.b32.xlu0 %v4392_v27, %s3867_s14  ;;  %v2013_v13 = vsel %vm588_vm1, %v700_v29, %v3469_v28  ;;  %v2012_v27 = vsel %vm588_vm1, %v699_v1, %v3468_v18  ;;  %v965_v29 = vld [vmem:[#allocation2 + $0x1a2] sm:$0xff] }
 0x1dd   : > { %v2158_v22 = vsel %vm2153_vm7, %v2125_v26, %v3348_v42  ;;  %v2159_v32 = vsel %vm2153_vm7, %v2126_v46, %v3349_v57  ;;  %v3472_v5 = vpop.permute.xlu1 %3471  ;;  %v3462_v54 = vpop.permute.xlu0 %3461  ;;  %v2044_v10 = vsel %vm2022_vm4, %v4522_v36, %v3264_v49  ;;  %v933_v49 = vld [vmem:[#allocation2 + $0x1a1] sm:$0xff] }
 0x1de   : > { %v3474_v23 = vunpack.i.h.bf16 %v3472_v5  ;;  %v3473_v55 = vunpack.i.l.bf16 %v3472_v5  ;;  %v3464_v3 = vunpack.i.h.bf16 %v3462_v54  ;;  %v3463_v45 = vunpack.i.l.bf16 %v3462_v54 }
 0x1df   : > { %3761 = vrot.lane.b32.xlu1 %v4406_v6, %s3867_s14  ;;  %v2191_v53 = vsel %vm2186_vm8, %v2158_v22, %v3353_v20  ;;  %v2192_v39 = vsel %vm2186_vm8, %v2159_v32, %v3354_v15  ;;  %v3389_v22 = vunpack.i.h.bf16 %v4386_v4  ;;  %v3388_v32 = vunpack.i.l.bf16 %v4386_v4 }
 0x1e0   : > { %v2045_v60 = vsel %vm2022_vm4, %v2012_v27, %v3473_v55  ;;  %v2046_v30 = vsel %vm2022_vm4, %v2013_v13, %v3474_v23  ;;  %v4582_v31 = vsel %vm2219_vm9, %v2206_v34, %v3464_v3  ;;  %v4585_v47 = vsel %vm2219_vm9, %v2205_v37, %v3463_v45  ;;  %3756 = vrot.lane.b32.xlu0 %v4394_v40, %s3869_s16  ;;  %v3819_v34 = vld [vmem:[#allocation2 + $0xf0] sm:$0xff] }
 0x1e1   : > { %v2078_v9 = vsel %vm2055_vm5, %v2045_v60, %v3373_v61  ;;  %v2079_v56 = vsel %vm2055_vm5, %v2046_v30, %v3374_v7  ;;  %v2261_v57 = vpack.c.bf16 %v4582_v31, %v4585_v47  ;;  %v4593_v42 = vpop.permute.xlu1 %3491  ;;  %v3477_v15 = vpop.permute.xlu0 %3476  ;;  %v2224_v20 = vsel %vm2219_vm9, %v2191_v53, %v3358_v16 }
 0x1e2   : > { %v2010_v37 = vsel %vm588_vm1, %v3819_v34, %v3258_v48  ;;  %v3383_v40 = vunpack.i.l.bf16 %v4358_v2  ;;  %v3479_v61 = vunpack.i.h.bf16 %v3477_v15  ;;  %v3478_v59 = vunpack.i.l.bf16 %v3477_v15 }
 0x1e3   : > { %v2225_v7 = vsel %vm2219_vm9, %v2192_v39, %v3359_v11  ;;  %3766 = vrot.lane.b32.xlu1 %v4408_v14, %s3869_s16  ;;  %v2110_v43 = vsel %vm346_vm0, %v2078_v9, %v3378_v51  ;;  %v2111_v44 = vsel %vm346_vm0, %v2079_v56, %v3379_v50  ;;  %v2043_v21 = vsel %vm2022_vm4, %v2010_v37, %v3263_v62 }
 0x1e4   : > { %v2254_v58 = vpack.c.bf16 %v2225_v7, %v2224_v20  ;;  %3771 = vrot.lane.b32.xlu0 %v4423_v35, %s3871_s18  ;;  %v4609_v25 = vsel %vm2120_vm6, %v2110_v43, %v3383_v40  ;;  %v4614_v17 = vsel %vm2120_vm6, %v2111_v44, %v3384_v0  ;;  %v2077_v50 = vsel %vm2055_vm5, %v2044_v10, %v3479_v61  ;;  %v689_v40 = vld [vmem:[#allocation2 + $0x90] sm:$0xff]  ;;  %v690_v61 = vld [vmem:[#allocation2 + $0x98] sm:$0xff] }
 0x1e5   : > { %v4611_v48 = vpop.permute.xlu1 %3496  ;;  %v3482_v2 = vpop.permute.xlu0 %3481  ;;  %v2076_v51 = vsel %vm2055_vm5, %v2043_v21, %v3478_v59  ;;  %v3785_v5 = vpack.i.bf16 %v933_v49, %v932_v24  ;;  %v3394_v23 = vunpack.i.h.bf16 %v4421_v33  ;;  %v3393_v55 = vunpack.i.l.bf16 %v4421_v33 }
 0x1e6   : > { %3092 = vmatprep.mubr.msk.bf16.mxu1 %vm2295_vm10, %v2254_v58  ;;  %v3484_v28 = vunpack.i.h.bf16 %v3482_v2  ;;  %v3483_v18 = vunpack.i.l.bf16 %v3482_v2  ;;  %v3399_v27 = vunpack.i.h.bf16 %v4451_v19  ;;  %v3398_v53 = vunpack.i.l.bf16 %v4451_v19 }
 0x1e7   : > { %3776 = vrot.lane.b32.xlu1 %v4408_v14, %s3866_s11 }
 0x1e8   : > { %v2108_v26 = vsel %vm346_vm0, %v2076_v51, %v3483_v18  ;;  %v2109_v62 = vsel %vm346_vm0, %v2077_v50, %v3484_v28  ;;  %3791 = vrot.lane.b32.xlu0 %v4406_v6, %s3868_s15  ;;  %v964_v6 = vld [vmem:[#allocation2 + $0x19a] sm:$0xff]  ;;  %s5066_s15 = scalar_lea.vmem %s5202_s7, %s2935_s29 }
 0x1e9   : > { %v4632_v36 = vpop.permute.xlu1 %3501  ;;  %v3487_v46 = vpop.permute.xlu0 %3486 }
 0x1ea   : > { %v3489_v11 = vunpack.i.h.bf16 %v3487_v46  ;;  %v3488_v16 = vunpack.i.l.bf16 %v3487_v46 }
 0x1eb   : > { %3781 = vrot.lane.b32.xlu1 %v4423_v35, %s3865_s10 }
 0x1ec   : > { %v2141_v54 = vsel %vm2120_vm6, %v2108_v26, %v3488_v16  ;;  %v2142_v1 = vsel %vm2120_vm6, %v2109_v62, %v3489_v11  ;;  %3796 = vrot.lane.b32.xlu0 %v4408_v14, %s3870_s17  ;;  %v3810_v14 = vpack.i.bf16 %v965_v29, %v964_v6 }
 0x1ed   : > { %v2174_v3 = vsel %vm2153_vm7, %v2141_v54, %v3388_v32  ;;  %v2175_v4 = vsel %vm2153_vm7, %v2142_v1, %v3389_v22  ;;  %v3522_v45 = vpop.permute.xlu1 %3521  ;;  %v4646_v13 = vpop.permute.xlu0 %3506 }
 0x1ee   : > { %v2207_v39 = vsel %vm2186_vm8, %v2174_v3, %v3393_v55  ;;  %v2208_v60 = vsel %vm2186_vm8, %v2175_v4, %v3394_v23  ;;  %v3524_v20 = vunpack.i.h.bf16 %v3522_v45  ;;  %v3523_v34 = vunpack.i.l.bf16 %v3522_v45  ;;  %v687_v3 = vld [vmem:[#allocation2 + $0x78] sm:$0xff] }
 0x1ef   : > { %3786 = vrot.lane.b32.xlu1 %v3785_v5, %s3869_s16  ;;  %v4656_v33 = vsel %vm2219_vm9, %v2207_v39, %v3398_v53  ;;  %v4659_v30 = vsel %vm2219_vm9, %v2208_v60, %v3399_v27  ;;  %v3493_v27 = vunpack.i.l.bf16 %v4593_v42  ;;  %v3499_v39 = vunpack.i.h.bf16 %v4611_v48 }
 0x1f0   : > { %3801 = vrot.lane.b32.xlu0 %v4423_v35, %s3872_s19  ;;  %v2262_v19 = vpack.c.bf16 %v4659_v30, %v4656_v33  ;;  %v2003_v43 = vsel %vm588_vm1, %v690_v61, %v3524_v20  ;;  %v2002_v44 = vsel %vm588_vm1, %v689_v40, %v3523_v34  ;;  %v3498_v60 = vunpack.i.l.bf16 %v4611_v48 }
 0x1f1   : > { %v4661_v9 = vpop.permute.xlu1 %3531  ;;  %v4663_v56 = vpop.permute.xlu0 %3511 }
 0x1f3   : > { %3811 = vrot.lane.b32.xlu1 %v3810_v14, %s3871_s18 }
 0x1f4   : > { %3806 = vrot.lane.b32.xlu0 %v4396_v41, %s3871_s18 }
 0x1f5   : > { %v4670_v15 = vpop.permute.xlu1 %3536  ;;  %v4672_v35 = vpop.permute.xlu0 %3516 }
 0x1f9   : > { %v4674_v37 = vpop.permute.xlu1 %3541  ;;  %v3527_v0 = vpop.permute.xlu0 %3526 }
 0x1fa   : > { %v3529_v59 = vunpack.i.h.bf16 %v3527_v0  ;;  %v3528_v7 = vunpack.i.l.bf16 %v3527_v0 }
 0x1fc   : > { %v4679_v58 = vsel %vm2022_vm4, %v2003_v43, %v3529_v59  ;;  %v4682_v41 = vsel %vm2022_vm4, %v2002_v44, %v3528_v7  ;;  %v3504_v43 = vunpack.i.h.bf16 %v4632_v36  ;;  %v3503_v44 = vunpack.i.l.bf16 %v4632_v36 }
 0x1fd   : > { %v3557_v2 = vpop.permute.xlu1 %3556  ;;  %v4684_v21 = vpop.permute.xlu0 %3546 }
 0x1fe   : > { %v3559_v18 = vunpack.i.h.bf16 %v3557_v2  ;;  %v3558_v50 = vunpack.i.l.bf16 %v3557_v2 }
 0x200   : > { %v2160_v49 = vsel %vm2153_vm7, %v4534_v38, %v3558_v50  ;;  %v2161_v46 = vsel %vm2153_vm7, %v4537_v12, %v3559_v18  ;;  %v688_v38 = vld [vmem:[#allocation2 + $0x80] sm:$0xff]  ;;  %v3494_v12 = vunpack.i.h.bf16 %v4593_v42 }
 0x201   : > { %v3562_v10 = vpop.permute.xlu1 %3561  ;;  %v4686_v28 = vpop.permute.xlu0 %3551 }
 0x202   : > { %v3564_v51 = vunpack.i.h.bf16 %v3562_v10  ;;  %v3563_v26 = vunpack.i.l.bf16 %v3562_v10 }
 0x204   : > { %v2193_v22 = vsel %vm2186_vm8, %v2160_v49, %v3563_v26  ;;  %v2194_v32 = vsel %vm2186_vm8, %v2161_v46, %v3564_v51  ;;  %v3509_v26 = vunpack.i.h.bf16 %v4646_v13  ;;  %v5222_v46 = vld [vmem:[#allocation12_spill] sm:$0xff] }
 0x205   : > { %v3572_v62 = vpop.permute.xlu1 %3571  ;;  %v3567_v24 = vpop.permute.xlu0 %3566 }
 0x206   : > { %v3569_v11 = vunpack.i.h.bf16 %v3567_v24  ;;  %v3568_v16 = vunpack.i.l.bf16 %v3567_v24  ;;  %v3574_v5 = vunpack.i.h.bf16 %v3572_v62  ;;  %v3573_v54 = vunpack.i.l.bf16 %v3572_v62 }
 0x207   : > { %v3508_v62 = vunpack.i.l.bf16 %v4646_v13 }
 0x208   : > { %v2227_v1 = vsel %vm2219_vm9, %v2194_v32, %v3569_v11  ;;  %v2226_v6 = vsel %vm2219_vm9, %v2193_v22, %v3568_v16  ;;  %v2001_v53 = vsel %vm588_vm1, %v688_v38, %v3574_v5  ;;  %v2000_v14 = vsel %vm588_vm1, %v687_v3, %v3573_v54 }
 0x209   : > { %v2255_v29 = vpack.c.bf16 %v2227_v1, %v2226_v6  ;;  %v3577_v23 = vpop.permute.xlu1 %3576  ;;  %v3582_v55 = vpop.permute.xlu0 %3581  ;;  %v3513_v6 = vunpack.i.l.bf16 %v4663_v56 }
 0x20a   : > { %v3579_v4 = vunpack.i.h.bf16 %v3577_v23  ;;  %v3578_v45 = vunpack.i.l.bf16 %v3577_v23  ;;  %v3584_v61 = vunpack.i.h.bf16 %v3582_v55  ;;  %v3583_v42 = vunpack.i.l.bf16 %v3582_v55 }
 0x20b   : > { %3093 = vmatmul.mubr.msk.bf16.gmra.mrb[20].mxu1 %vm2295_vm10, %v2255_v29 }
 0x20c   : > { %v2033_v20 = vsel %vm2022_vm4, %v2000_v14, %v3578_v45  ;;  %v2034_v34 = vsel %vm2022_vm4, %v2001_v53, %v3579_v4  ;;  %v2064_v36 = vsel %vm2055_vm5, %v4378_v52, %v3583_v42  ;;  %v2065_v11 = vsel %vm2055_vm5, %v5222_v46, %v3584_v61 }
 0x20d   : > { %v2066_v0 = vsel %vm2055_vm5, %v2033_v20, %v3493_v27  ;;  %v2067_v40 = vsel %vm2055_vm5, %v2034_v34, %v3494_v12  ;;  %v3597_v59 = vpop.permute.xlu1 %3596  ;;  %v3587_v7 = vpop.permute.xlu0 %3586  ;;  %v3519_v4 = vunpack.i.h.bf16 %v4672_v35  ;;  %v3518_v45 = vunpack.i.l.bf16 %v4672_v35 }
 0x20e   : > { %v3599_v2 = vunpack.i.h.bf16 %v3597_v59  ;;  %v3598_v10 = vunpack.i.l.bf16 %v3597_v59  ;;  %v3589_v18 = vunpack.i.h.bf16 %v3587_v7  ;;  %v3588_v48 = vunpack.i.l.bf16 %v3587_v7 }
 0x20f   : > { %v2098_v50 = vsel %vm346_vm0, %v2066_v0, %v3498_v60  ;;  %v2099_v51 = vsel %vm346_vm0, %v2067_v40, %v3499_v39 }
 0x210   : > { %v2176_v24 = vsel %vm2153_vm7, %v4609_v25, %v3598_v10  ;;  %v2177_v49 = vsel %vm2153_vm7, %v4614_v17, %v3599_v2  ;;  %v4722_v32 = vsel %vm2120_vm6, %v2098_v50, %v3503_v44  ;;  %v4725_v5 = vsel %vm2120_vm6, %v2099_v51, %v3504_v43  ;;  %v703_v43 = vld [vmem:[#allocation2 + $0x138] sm:$0xff]  ;;  %v704_v44 = vld [vmem:[#allocation2 + $0x140] sm:$0xff] }
 0x211   : > { %v3602_v16 = vpop.permute.xlu1 %3601  ;;  %v3592_v22 = vpop.permute.xlu0 %3591  ;;  %v3514_v17 = vunpack.i.h.bf16 %v4663_v56  ;;  %v2096_v52 = vsel %vm346_vm0, %v2064_v36, %v3588_v48  ;;  %v2097_v29 = vsel %vm346_vm0, %v2065_v11, %v3589_v18  ;;  %v3534_v50 = vunpack.i.h.bf16 %v4661_v9 }
 0x212   : > { %v3604_v13 = vunpack.i.h.bf16 %v3602_v16  ;;  %v3603_v54 = vunpack.i.l.bf16 %v3602_v16  ;;  %v3594_v25 = vunpack.i.h.bf16 %v3592_v22  ;;  %v3593_v1 = vunpack.i.l.bf16 %v3592_v22 }
 0x213   : > { %v3533_v51 = vunpack.i.l.bf16 %v4661_v9  ;;  %v3544_v11 = vunpack.i.h.bf16 %v4674_v37  ;;  %v3543_v16 = vunpack.i.l.bf16 %v4674_v37 }
 0x214   : > { %v2209_v23 = vsel %vm2186_vm8, %v2176_v24, %v3603_v54  ;;  %v2210_v55 = vsel %vm2186_vm8, %v2177_v49, %v3604_v13  ;;  %v2129_v3 = vsel %vm2120_vm6, %v2096_v52, %v3593_v1  ;;  %v2130_v38 = vsel %vm2120_vm6, %v2097_v29, %v3594_v25 }
 0x215   : > { %v2162_v12 = vsel %vm2153_vm7, %v2129_v3, %v3508_v62  ;;  %v2163_v56 = vsel %vm2153_vm7, %v2130_v38, %v3509_v26  ;;  %v3612_v27 = vpop.permute.xlu1 %3611  ;;  %v3607_v39 = vpop.permute.xlu0 %3606  ;;  %v3539_v24 = vunpack.i.h.bf16 %v4670_v15  ;;  %v3538_v49 = vunpack.i.l.bf16 %v4670_v15 }
 0x216   : > { %v3614_v53 = vunpack.i.h.bf16 %v3612_v27  ;;  %v3613_v14 = vunpack.i.l.bf16 %v3612_v27  ;;  %v2195_v60 = vsel %vm2186_vm8, %v2162_v12, %v3513_v6  ;;  %v2196_v20 = vsel %vm2186_vm8, %v2163_v56, %v3514_v17 }
 0x217   : > { %v3609_v34 = vunpack.i.h.bf16 %v3607_v39  ;;  %v3608_v0 = vunpack.i.l.bf16 %v3607_v39  ;;  %v2228_v40 = vsel %vm2219_vm9, %v2195_v60, %v3518_v45  ;;  %v2229_v61 = vsel %vm2219_vm9, %v2196_v20, %v3519_v4 }
 0x218   : > { %v2256_v42 = vpack.c.bf16 %v2229_v61, %v2228_v40  ;;  %v2017_v26 = vsel %vm588_vm1, %v704_v44, %v3614_v53  ;;  %v2016_v62 = vsel %vm588_vm1, %v703_v43, %v3613_v14  ;;  %v3549_v12 = vunpack.i.h.bf16 %v4684_v21 }
 0x219   : > { %v4744_v35 = vsel %vm2219_vm9, %v2210_v55, %v3609_v34  ;;  %v4747_v59 = vsel %vm2219_vm9, %v2209_v23, %v3608_v0  ;;  %v3617_v7 = vpop.permute.xlu1 %3616  ;;  %v3622_v48 = vpop.permute.xlu0 %3621  ;;  %v3548_v56 = vunpack.i.l.bf16 %v4684_v21  ;;  %v3554_v14 = vunpack.i.h.bf16 %v4686_v28 }
 0x21a   : > { %v2263_v2 = vpack.c.bf16 %v4744_v35, %v4747_v59  ;;  %v3619_v10 = vunpack.i.h.bf16 %v3617_v7  ;;  %v3618_v18 = vunpack.i.l.bf16 %v3617_v7  ;;  %3096 = vmatprep.mubr.msk.bf16.mxu1 %vm2295_vm10, %v2256_v42  ;;  %v3624_v15 = vunpack.i.h.bf16 %v3622_v48  ;;  %v5223_v7 = vld [vmem:[#allocation3_spill] sm:$0xff] }
 0x21b   : > { %v3623_v17 = vunpack.i.l.bf16 %v3622_v48  ;;  %v3553_v39 = vunpack.i.l.bf16 %v4686_v28  ;;  %v3244_v43 = vunpack.i.h.bf16 %v5223_v7  ;;  %v3243_v44 = vunpack.i.l.bf16 %v5223_v7 }
 0x21c   : > { %v2049_v36 = vsel %vm2022_vm4, %v2016_v62, %v3618_v18  ;;  %v2050_v46 = vsel %vm2022_vm4, %v2017_v26, %v3619_v10  ;;  %v2081_v38 = vsel %vm2055_vm5, %v4481_v8, %v3624_v15  ;;  %v5224_v10 = vld [vmem:[#allocation4_spill] sm:$0xff]  ;;  %v5225_v26 = vld [vmem:[#allocation5_spill] sm:$0xff] }
 0x21d   : > { %v2082_v22 = vsel %vm2055_vm5, %v2049_v36, %v3533_v51  ;;  %v2083_v9 = vsel %vm2055_vm5, %v2050_v46, %v3534_v50  ;;  %v4764_v13 = vpop.permute.xlu1 %3636  ;;  %v3627_v54 = vpop.permute.xlu0 %3626  ;;  %v2080_v3 = vsel %vm2055_vm5, %v4484_v63, %v3623_v17  ;;  %v3249_v18 = vunpack.i.h.bf16 %v5224_v10  ;;  %v2557_v50 = vld [vmem:[%s5200_s5] sm:$0x3]  ;;  %v5226_v36 = vld [vmem:[#allocation6_spill] sm:$0xff] }
 0x21e   : > { %v2114_v25 = vsel %vm346_vm0, %v2082_v22, %v3538_v49  ;;  %v2115_v1 = vsel %vm346_vm0, %v2083_v9, %v3539_v24  ;;  %v3629_v37 = vunpack.i.h.bf16 %v3627_v54  ;;  %v3628_v29 = vunpack.i.l.bf16 %v3627_v54  ;;  %3157 = vmatprep.subr.msk.bf16.mxu0 %vm2344_vm3, %v2557_v50  ;;  %v5227_v9 = vld [vmem:[#allocation7_spill] sm:$0xff] }
 0x21f   : > { %v4769_v6 = vsel %vm2120_vm6, %v2114_v25, %v3543_v16  ;;  %v4772_v52 = vsel %vm2120_vm6, %v2115_v1, %v3544_v11  ;;  %v3248_v51 = vunpack.i.l.bf16 %v5224_v10  ;;  %v3254_v62 = vunpack.i.h.bf16 %v5225_v26  ;;  %v5228_v25 = vld [vmem:[#allocation9_spill] sm:$0xff] }
 0x220   : > { %v2112_v27 = vsel %vm346_vm0, %v2080_v3, %v3628_v29  ;;  %v2113_v53 = vsel %vm346_vm0, %v2081_v38, %v3629_v37  ;;  %v3253_v24 = vunpack.i.l.bf16 %v5225_v26  ;;  %v2614_v49 = vsel %vm2344_vm3, %v2557_v50, 0 }
 0x221   : > { %v4774_v23 = vpop.permute.xlu1 %3641  ;;  %v3632_v55 = vpop.permute.xlu0 %3631  ;;  %v3294_v46 = vunpack.i.h.bf16 %v5226_v36  ;;  %v3293_v11 = vunpack.i.l.bf16 %v5226_v36  ;;  %3121 = vmatpush3.bf16.msra.mxu0 %v2614_v49  ;;  %v3298_v54 = vunpack.i.l.bf16 %v5227_v9  ;;  %v3319_v1 = vunpack.i.h.bf16 %v5228_v25 }
 0x222   : > { %v3634_v4 = vunpack.i.h.bf16 %v3632_v55  ;;  %v3633_v45 = vunpack.i.l.bf16 %v3632_v55  ;;  %v3318_v29 = vunpack.i.l.bf16 %v5228_v25  ;;  %v5229_v55 = vld [vmem:[#allocation10_spill] sm:$0xff] }
 0x223   : > { %v3324_v3 = vunpack.i.h.bf16 %v5229_v55  ;;  %v3323_v38 = vunpack.i.l.bf16 %v5229_v55 }
 0x224   : > { %v2145_v60 = vsel %vm2120_vm6, %v2112_v27, %v3633_v45  ;;  %v2146_v63 = vsel %vm2120_vm6, %v2113_v53, %v3634_v4  ;;  %v5230_v4 = vld [vmem:[#allocation11_spill] sm:$0xff]  ;;  %v3639_v27 = vunpack.i.h.bf16 %v4764_v13  ;;  %v693_v53 = vld [vmem:[#allocation2 + $0xc0] sm:$0xff] }
 0x225   : > { %v4788_v20 = vpop.permute.xlu1 %3646  ;;  %v2178_v8 = vsel %vm2153_vm7, %v2145_v60, %v3548_v56  ;;  %v2179_v34 = vsel %vm2153_vm7, %v2146_v63, %v3549_v12  ;;  %v4792_v0 = vpop.permute.xlu0 %3651  ;;  %v3329_v45 = vunpack.i.h.bf16 %v5230_v4  ;;  %v3328_v56 = vunpack.i.l.bf16 %v5230_v4 }
 0x226   : > { %v4795_v21 = vsel %vm2186_vm8, %v2178_v8, %v3553_v39  ;;  %v4798_v40 = vsel %vm2186_vm8, %v2179_v34, %v3554_v14  ;;  %v694_v14 = vld [vmem:[#allocation2 + $0xc8] sm:$0xff]  ;;  %v3654_v26 = vunpack.i.h.bf16 %v4792_v0 }
 0x229   : > { %v3667_v61 = vpop.permute.xlu1 %3666  ;;  %v4800_v28 = vpop.permute.xlu0 %3656 }
 0x22a   : > { %v3669_v16 = vunpack.i.h.bf16 %v3667_v61  ;;  %v3668_v22 = vunpack.i.l.bf16 %v3667_v61 }
 0x22c   : > { %v2007_v63 = vsel %vm588_vm1, %v694_v14, %v3669_v16  ;;  %v2006_v8 = vsel %vm588_vm1, %v693_v53, %v3668_v22 }
 0x22d   : > { %v3677_v42 = vpop.permute.xlu1 %3676  ;;  %v4805_v48 = vpop.permute.xlu0 %3661 }
 0x22e   : > { %v3679_v15 = vunpack.i.h.bf16 %v3677_v42  ;;  %v3678_v17 = vunpack.i.l.bf16 %v3677_v42 }
 0x230   : > { %v2164_v42 = vsel %vm2153_vm7, %v4722_v32, %v3678_v17  ;;  %v2165_v7 = vsel %vm2153_vm7, %v4725_v5, %v3679_v15 }
 0x231   : > { %v3682_v37 = vpop.permute.xlu1 %3681  ;;  %v3672_v12 = vpop.permute.xlu0 %3671 }
 0x232   : > { %v3674_v39 = vunpack.i.h.bf16 %v3672_v12  ;;  %v3673_v60 = vunpack.i.l.bf16 %v3672_v12  ;;  %v3684_v34 = vunpack.i.h.bf16 %v3682_v37  ;;  %v3683_v61 = vunpack.i.l.bf16 %v3682_v37 }
 0x234   : > { %v2040_v50 = vsel %vm2022_vm4, %v2007_v63, %v3674_v39  ;;  %v2039_v49 = vsel %vm2022_vm4, %v2006_v8, %v3673_v60  ;;  %v2197_v5 = vsel %vm2186_vm8, %v2164_v42, %v3683_v61  ;;  %v2198_v15 = vsel %vm2186_vm8, %v2165_v7, %v3684_v34 }
 0x235   : > { %v3692_v25 = vpop.permute.xlu1 %3691  ;;  %v2072_v55 = vsel %vm2055_vm5, %v2039_v49, %v3318_v29  ;;  %v2073_v4 = vsel %vm2055_vm5, %v2040_v50, %v3319_v1  ;;  %v3687_v22 = vpop.permute.xlu0 %3686  ;;  %v3644_v34 = vunpack.i.h.bf16 %v4774_v23  ;;  %v3821_v49 = vld [vmem:[#allocation2 + $0xa8] sm:$0xff] }
 0x236   : > { %v3694_v16 = vunpack.i.h.bf16 %v3692_v25  ;;  %v3693_v12 = vunpack.i.l.bf16 %v3692_v25  ;;  %v2104_v37 = vsel %vm346_vm0, %v2072_v55, %v3323_v38  ;;  %v2105_v53 = vsel %vm346_vm0, %v2073_v4, %v3324_v3 }
 0x237   : > { %v3689_v32 = vunpack.i.h.bf16 %v3687_v22  ;;  %v3688_v17 = vunpack.i.l.bf16 %v3687_v22  ;;  %v2137_v14 = vsel %vm2120_vm6, %v2104_v37, %v3328_v56  ;;  %v2138_v39 = vsel %vm2120_vm6, %v2105_v53, %v3329_v45  ;;  %v3820_v45 = vld [vmem:[#allocation2 + $0xb0] sm:$0xff] }
 0x238   : > { %v2170_v63 = vsel %vm2153_vm7, %v2137_v14, %v3243_v44  ;;  %v2171_v38 = vsel %vm2153_vm7, %v2138_v39, %v3244_v43  ;;  %v3638_v3 = vunpack.i.l.bf16 %v4764_v13  ;;  %v3643_v56 = vunpack.i.l.bf16 %v4774_v23 }
 0x239   : > { %v2231_v29 = vsel %vm2219_vm9, %v2198_v15, %v3689_v32  ;;  %v2230_v1 = vsel %vm2219_vm9, %v2197_v5, %v3688_v17  ;;  %v3697_v60 = vpop.permute.xlu1 %3696  ;;  %v3702_v42 = vpop.permute.xlu0 %3701  ;;  %v2005_v7 = vsel %vm588_vm1, %v3820_v45, %v3694_v16  ;;  %v2004_v25 = vsel %vm588_vm1, %v3821_v49, %v3693_v12 }
 0x23a   : > { %v2257_v8 = vpack.c.bf16 %v2231_v29, %v2230_v1  ;;  %v3699_v50 = vunpack.i.h.bf16 %v3697_v60  ;;  %v3698_v61 = vunpack.i.l.bf16 %v3697_v60  ;;  %v2203_v13 = vsel %vm2186_vm8, %v2170_v63, %v3248_v51  ;;  %v5231_v1 = vld [vmem:[#allocation8_spill] sm:$0xff] }
 0x23b   : > { %v2204_v23 = vsel %vm2186_vm8, %v2171_v38, %v3249_v18  ;;  %v3649_v55 = vunpack.i.h.bf16 %v4788_v20  ;;  %v3648_v4 = vunpack.i.l.bf16 %v4788_v20  ;;  %v3704_v32 = vunpack.i.h.bf16 %v3702_v42 }
 0x23c   : > { %v2037_v44 = vsel %vm2022_vm4, %v2004_v25, %v3698_v61  ;;  %v2038_v43 = vsel %vm2022_vm4, %v2005_v7, %v3699_v50  ;;  %3097 = vmatmul.mubr.msk.bf16.gmra.mrb[24].mxu1 %vm2295_vm10, %v2257_v8  ;;  %v3703_v51 = vunpack.i.l.bf16 %v3702_v42  ;;  %v2236_v20 = vsel %vm2219_vm9, %v2203_v13, %v3253_v24 }
 0x23d   : > { %v2070_v16 = vsel %vm2055_vm5, %v2037_v44, %v3638_v3  ;;  %v2071_v12 = vsel %vm2055_vm5, %v2038_v43, %v3639_v27  ;;  %v4863_v22 = vpop.permute.xlu1 %3721  ;;  %v3707_v17 = vpop.permute.xlu0 %3706  ;;  %v2237_v27 = vsel %vm2219_vm9, %v2204_v23, %v3254_v62  ;;  %v3299_v29 = vunpack.i.h.bf16 %v5227_v9 }
 0x23e   : > { %v2102_v37 = vsel %vm346_vm0, %v2070_v16, %v3643_v56  ;;  %v2103_v53 = vsel %vm346_vm0, %v2071_v12, %v3644_v34  ;;  %v3709_v5 = vunpack.i.h.bf16 %v3707_v17  ;;  %v3708_v15 = vunpack.i.l.bf16 %v3707_v17 }
 0x23f   : > { %v2135_v10 = vsel %vm2120_vm6, %v2102_v37, %v3648_v4  ;;  %v2136_v18 = vsel %vm2120_vm6, %v2103_v53, %v3649_v55  ;;  %v3304_v60 = vunpack.i.h.bf16 %v5231_v1  ;;  %v3303_v24 = vunpack.i.l.bf16 %v5231_v1 }
 0x240   : > { %v2168_v14 = vsel %vm2153_vm7, %v2135_v10, %v3293_v11  ;;  %v2169_v39 = vsel %vm2153_vm7, %v2136_v18, %v3294_v46  ;;  %v3653_v62 = vunpack.i.l.bf16 %v4792_v0  ;;  %v2068_v38 = vsel %vm2055_vm5, %v4682_v41, %v3703_v51 }
 0x241   : > { %v4885_v63 = vpop.permute.xlu1 %3731  ;;  %v2069_v36 = vsel %vm2055_vm5, %v4679_v58, %v3704_v32  ;;  %v3712_v11 = vpop.permute.xlu0 %3711  ;;  %v2201_v46 = vsel %vm2186_vm8, %v2168_v14, %v3298_v54  ;;  %v2202_v50 = vsel %vm2186_vm8, %v2169_v39, %v3299_v29  ;;  %v2260_v61 = vpack.c.bf16 %v2237_v27, %v2236_v20 }
 0x242   : > { %v3714_v3 = vunpack.i.h.bf16 %v3712_v11  ;;  %v3713_v8 = vunpack.i.l.bf16 %v3712_v11  ;;  %v3659_v42 = vunpack.i.h.bf16 %v4800_v28  ;;  %v3658_v0 = vunpack.i.l.bf16 %v4800_v28 }
 0x243   : > { %v2100_v34 = vsel %vm346_vm0, %v2068_v38, %v3708_v15  ;;  %v2101_v41 = vsel %vm346_vm0, %v2069_v36, %v3709_v5  ;;  %v3664_v58 = vunpack.i.h.bf16 %v4805_v48  ;;  %v3663_v56 = vunpack.i.l.bf16 %v4805_v48 }
 0x244   : > { %v2133_v9 = vsel %vm2120_vm6, %v2100_v34, %v3713_v8  ;;  %v2134_v54 = vsel %vm2120_vm6, %v2101_v41, %v3714_v3  ;;  %v2234_v28 = vsel %vm2219_vm9, %v2201_v46, %v3303_v24  ;;  %v2235_v44 = vsel %vm2219_vm9, %v2202_v50, %v3304_v60  ;;  %v706_v24 = vld [vmem:[#allocation2 + $0x158] sm:$0xff] }
 0x245   : > { %v4904_v45 = vpop.permute.xlu1 %3736  ;;  %v2166_v7 = vsel %vm2153_vm7, %v2133_v9, %v3653_v62  ;;  %v2167_v49 = vsel %vm2153_vm7, %v2134_v54, %v3654_v26  ;;  %v2259_v17 = vpack.c.bf16 %v2235_v44, %v2234_v28  ;;  %v3724_v5 = vunpack.i.h.bf16 %v4863_v22 }
 0x246   : > { %v3717_v25 = vpop.permute.xlu0 %3716  ;;  %v2199_v23 = vsel %vm2186_vm8, %v2166_v7, %v3658_v0  ;;  %v2200_v48 = vsel %vm2186_vm8, %v2167_v49, %v3659_v42  ;;  %v3723_v14 = vunpack.i.l.bf16 %v4863_v22  ;;  %v3733_v46 = vunpack.i.l.bf16 %v4885_v63 }
 0x247   : > { %v3719_v43 = vunpack.i.h.bf16 %v3717_v25  ;;  %v3718_v13 = vunpack.i.l.bf16 %v3717_v25  ;;  %v2232_v55 = vsel %vm2219_vm9, %v2199_v23, %v3663_v56  ;;  %v2233_v4 = vsel %vm2219_vm9, %v2200_v48, %v3664_v58  ;;  %v3823_v23 = vld [vmem:[#allocation2 + $0x168] sm:$0xff] }
 0x248   : > { %v2258_v53 = vpack.c.bf16 %v2233_v4, %v2232_v55  ;;  %v2019_v22 = vsel %vm588_vm1, %v706_v24, %v3724_v5  ;;  %v3739_v50 = vunpack.i.h.bf16 %v4904_v45 }
 0x249   : > { %v2244_v16 = vsel %vm2219_vm9, %v4795_v21, %v3718_v13  ;;  %v2245_v12 = vsel %vm2219_vm9, %v4798_v40, %v3719_v43  ;;  %v4918_v37 = vpop.permute.xlu1 %3741 }
 0x24a   : > { %v2264_v32 = vpack.c.bf16 %v2245_v12, %v2244_v16  ;;  %v3727_v51 = vpop.permute.xlu0 %3726  ;;  %3100 = vmatprep.mubr.msk.bf16.mxu1 %vm2295_vm10, %v2258_v53  ;;  %v3744_v34 = vunpack.i.h.bf16 %v4918_v37  ;;  %v3743_v41 = vunpack.i.l.bf16 %v4918_v37 }
 0x24b   : > { %3101 = vmatmul.mubr.msk.bf16.gmra.mrb[28].mxu1 %vm2295_vm10, %v2259_v17  ;;  %v3729_v26 = vunpack.i.h.bf16 %v3727_v51  ;;  %v3728_v62 = vunpack.i.l.bf16 %v3727_v51 }
 0x24c   : > { %3104 = vmatprep.mubr.msk.bf16.mxu1 %vm2295_vm10, %v2260_v61  ;;  %v3738_v61 = vunpack.i.l.bf16 %v4904_v45 }
 0x24d   : > { %v4923_v10 = vpop.permute.xlu1 %3751  ;;  %v2052_v58 = vsel %vm2022_vm4, %v2019_v22, %v3729_v26 }
 0x24e   : > { %v4925_v18 = vpop.permute.xlu0 %3746  ;;  %v3753_v9 = vunpack.i.l.bf16 %v4923_v10 }
 0x24f   : > { %v3749_v49 = vunpack.i.h.bf16 %v4925_v18  ;;  %v3748_v25 = vunpack.i.l.bf16 %v4925_v18 }
 0x251   : > { %v3762_v21 = vpop.permute.xlu1 %3761 }
 0x252   : > { %v4927_v20 = vpop.permute.xlu0 %3756  ;;  %v3764_v40 = vunpack.i.h.bf16 %v3762_v21  ;;  %v3763_v27 = vunpack.i.l.bf16 %v3762_v21 }
 0x253   : > { %3105 = vmatmul.mubr.msk.bf16.gmra.mrb[32].mxu1 %vm2295_vm10, %v2261_v57  ;;  %v3759_v35 = vunpack.i.h.bf16 %v4927_v20  ;;  %v3758_v59 = vunpack.i.l.bf16 %v4927_v20 }
 0x254   : > { %3108 = vmatprep.mubr.msk.bf16.mxu1 %vm2295_vm10, %v2262_v19  ;;  %v2180_v60 = vsel %vm2153_vm7, %v4769_v6, %v3763_v27  ;;  %v2181_v31 = vsel %vm2153_vm7, %v4772_v52, %v3764_v40  ;;  %v705_v19 = vld [vmem:[#allocation2 + $0x150] sm:$0xff]  ;;  %v3734_v52 = vunpack.i.h.bf16 %v4885_v63  ;;  %v3754_v63 = vunpack.i.h.bf16 %v4923_v10 }
 0x255   : > { %v3767_v15 = vpop.permute.xlu1 %3766  ;;  %v2018_v11 = vsel %vm588_vm1, %v705_v19, %v3723_v14 }
 0x256   : > { %v3769_v39 = vunpack.i.h.bf16 %v3767_v15  ;;  %v3768_v29 = vunpack.i.l.bf16 %v3767_v15  ;;  %v3772_v1 = vpop.permute.xlu0 %3771  ;;  %v2051_v56 = vsel %vm2022_vm4, %v2018_v11, %v3728_v62 }
 0x257   : > { %v3774_v47 = vunpack.i.h.bf16 %v3772_v1  ;;  %v3773_v57 = vunpack.i.l.bf16 %v3772_v1 }
 0x258   : > { %v2213_v33 = vsel %vm2186_vm8, %v2180_v60, %v3768_v29  ;;  %v2214_v30 = vsel %vm2186_vm8, %v2181_v31, %v3769_v39 }
 0x259   : > { %v2247_v38 = vsel %vm2219_vm9, %v2214_v30, %v3774_v47  ;;  %v2246_v36 = vsel %vm2219_vm9, %v2213_v33, %v3773_v57  ;;  %v3777_v6 = vpop.permute.xlu1 %3776 }
 0x25a   : > { %v2265_v3 = vpack.c.bf16 %v2247_v38, %v2246_v36  ;;  %v3792_v8 = vpop.permute.xlu0 %3791  ;;  %v3779_v42 = vunpack.i.h.bf16 %v3777_v6  ;;  %v3778_v0 = vunpack.i.l.bf16 %v3777_v6 }
 0x25b   : > { %3109 = vmatmul.mubr.msk.bf16.gmra.mrb[36].mxu1 %vm2295_vm10, %v2263_v2  ;;  %v3794_v54 = vunpack.i.h.bf16 %v3792_v8  ;;  %v3793_v45 = vunpack.i.l.bf16 %v3792_v8  ;;  %v3822_v2 = vld [vmem:[#allocation2 + $0x170] sm:$0xff] }
 0x25c   : > { %3112 = vmatprep.mubr.msk.bf16.mxu1 %vm2295_vm10, %v2264_v32  ;;  %v2021_v13 = vsel %vm588_vm1, %v3822_v2, %v3779_v42  ;;  %v2020_v48 = vsel %vm588_vm1, %v3823_v23, %v3778_v0  ;;  %v5002_v42 = vld [vmem:[%s5199_s4] ss:$0 sm:$0xff] }
 0x25d   : > { %v3782_v7 = vpop.permute.xlu1 %3781  ;;  %v2084_v37 = vsel %vm2055_vm5, %v2051_v56, %v3793_v45  ;;  %v2085_v53 = vsel %vm2055_vm5, %v2052_v58, %v3794_v54 }
 0x25e   : > { %v3784_v28 = vunpack.i.h.bf16 %v3782_v7  ;;  %v3783_v44 = vunpack.i.l.bf16 %v3782_v7  ;;  %v3797_v43 = vpop.permute.xlu0 %3796 }
 0x25f   : > { %v3799_v16 = vunpack.i.h.bf16 %v3797_v43  ;;  %v3798_v12 = vunpack.i.l.bf16 %v3797_v43 }
 0x260   : > { %v2053_v55 = vsel %vm2022_vm4, %v2020_v48, %v3783_v44  ;;  %v2054_v4 = vsel %vm2022_vm4, %v2021_v13, %v3784_v28 }
 0x261   : > { %v2086_v32 = vsel %vm2055_vm5, %v2053_v55, %v3733_v46  ;;  %v2087_v51 = vsel %vm2055_vm5, %v2054_v4, %v3734_v52  ;;  %v3787_v17 = vpop.permute.xlu1 %3786  ;;  %v2116_v39 = vsel %vm346_vm0, %v2084_v37, %v3798_v12  ;;  %v2117_v29 = vsel %vm346_vm0, %v2085_v53, %v3799_v16 }
 0x262   : > { %v2118_v10 = vsel %vm346_vm0, %v2086_v32, %v3738_v61  ;;  %v2119_v18 = vsel %vm346_vm0, %v2087_v51, %v3739_v50  ;;  %v3789_v21 = vunpack.i.h.bf16 %v3787_v17  ;;  %v3788_v20 = vunpack.i.l.bf16 %v3787_v17  ;;  %v3802_v40 = vpop.permute.xlu0 %3801 }
 0x263   : > { %v2151_v27 = vsel %vm2120_vm6, %v2118_v10, %v3743_v41  ;;  %v2152_v5 = vsel %vm2120_vm6, %v2119_v18, %v3744_v34  ;;  %v3804_v15 = vunpack.i.h.bf16 %v3802_v40  ;;  %v3803_v14 = vunpack.i.l.bf16 %v3802_v40  ;;  %3113 = vmatmul.mubr.msk.bf16.gmra.mrb[40].mxu1 %vm2295_vm10, %v2265_v3 }
 0x264   : > { %v2184_v1 = vsel %vm2153_vm7, %v2151_v27, %v3753_v9  ;;  %v2185_v60 = vsel %vm2153_vm7, %v2152_v5, %v3754_v63 }
 0x265   : > { %v2217_v31 = vsel %vm2186_vm8, %v2184_v1, %v3788_v20  ;;  %v2218_v47 = vsel %vm2186_vm8, %v2185_v60, %v3789_v21  ;;  %v2149_v57 = vsel %vm2120_vm6, %v2116_v39, %v3803_v14  ;;  %v2150_v24 = vsel %vm2120_vm6, %v2117_v29, %v3804_v15  ;;  %v3812_v26 = vpop.permute.xlu1 %3811 }
 0x266   : > { %v2182_v62 = vsel %vm2153_vm7, %v2149_v57, %v3748_v25  ;;  %v2183_v33 = vsel %vm2153_vm7, %v2150_v24, %v3749_v49  ;;  %v3814_v30 = vunpack.i.h.bf16 %v3812_v26  ;;  %v3813_v19 = vunpack.i.l.bf16 %v3812_v26  ;;  %v3807_v22 = vpop.permute.xlu0 %3806 }
 0x267   : > { %v3809_v38 = vunpack.i.h.bf16 %v3807_v22  ;;  %v3808_v36 = vunpack.i.l.bf16 %v3807_v22  ;;  %v2215_v6 = vsel %vm2186_vm8, %v2182_v62, %v3758_v59  ;;  %v2216_v11 = vsel %vm2186_vm8, %v2183_v33, %v3759_v35 }
 0x268   : > { %v2250_v52 = vsel %vm2219_vm9, %v2217_v31, %v3813_v19  ;;  %v2251_v46 = vsel %vm2219_vm9, %v2218_v47, %v3814_v30 }
 0x269   : > { %v2267_v3 = vpack.c.bf16 %v2251_v46, %v2250_v52  ;;  %v2248_v8 = vsel %vm2219_vm9, %v2215_v6, %v3808_v36  ;;  %v2249_v50 = vsel %vm2219_vm9, %v2216_v11, %v3809_v38 }
 0x26a   : > { %v2266_v61 = vpack.c.bf16 %v2249_v50, %v2248_v8 }
 0x26c   : > { %3116 = vmatprep.mubr.msk.bf16.mxu1 %vm2295_vm10, %v2266_v61 }
 0x26d   : > { %3117 = vmatmul.mubr.msk.bf16.gmra.mrb[44].mxu1 %vm2295_vm10, %v2267_v3 }
 0x2a6   : > { %v3090_v0 = vpop.f32.mrb[16].mxu1 }
 0x2a7   : > { %v2391_v34 = vadd.f32 %v3090_v0, %v5002_v42  ;;  %v2382_v41 = vpop.f32.mrb[17].mxu1 }
 0x2a8   : > { %v2383_v58 = vadd.f32 %v5002_v42, %v2382_v41  ;;  %v3091_v56 = vpop.f32.mrb[18].mxu1 }
 0x2a9   : > { %v2394_v63 = vadd.f32 %v3091_v56, %v5002_v42  ;;  %v2385_v9 = vpop.f32.mrb[19].mxu1  ;;  %v2511_v45 = vmax.f32 %v2391_v34, 0.0 }
 0x2aa   : > { %v2386_v54 = vadd.f32 %v5002_v42, %v2385_v9  ;;  %v2509_v49 = vmax.f32 %v2383_v58, 0.0 }
 0x2ab   : > { %v2512_v7 = vmax.f32 %v2394_v63, 0.0 }
 0x2ac   : > { %v2510_v25 = vmax.f32 %v2386_v54, 0.0 }
 0x2ad   : > { %v2542_v28 = vpack.c.bf16 %v2512_v7, %v2511_v45 }
 0x2ae   : > { %v2541_v44 = vpack.c.bf16 %v2510_v25, %v2509_v49 }
 0x2b0   : > { %3122 = vmatprep.mubr.msk.bf16.mxu0 %vm588_vm1, %v2541_v44 }
 0x2b1   : > { %3123 = vmatmul.mubr.msk.bf16.vlgmr.msra.gmra.mrb[16].mxu0 %vm588_vm1, %v2542_v28 }
 0x2de   : > { %v3094_v43 = vpop.f32.mrb[20].mxu1 }
 0x2df   : > { %v2407_v35 = vadd.f32 %v3094_v43, %v5002_v42  ;;  %v2398_v59 = vpop.f32.mrb[21].mxu1 }
 0x2e0   : > { %v2399_v2 = vadd.f32 %v5002_v42, %v2398_v59  ;;  %v3095_v13 = vpop.f32.mrb[22].mxu1 }
 0x2e1   : > { %v2410_v23 = vadd.f32 %v3095_v13, %v5002_v42  ;;  %v2401_v48 = vpop.f32.mrb[23].mxu1  ;;  %v2515_v4 = vmax.f32 %v2407_v35, 0.0 }
 0x2e2   : > { %v2402_v55 = vadd.f32 %v5002_v42, %v2401_v48  ;;  %v2513_v12 = vmax.f32 %v2399_v2, 0.0 }
 0x2e3   : > { %v2516_v16 = vmax.f32 %v2410_v23, 0.0 }
 0x2e4   : > { %v2514_v37 = vmax.f32 %v2402_v55, 0.0 }
 0x2e5   : > { %v2544_v53 = vpack.c.bf16 %v2516_v16, %v2515_v4 }
 0x2e6   : > { %v2543_v32 = vpack.c.bf16 %v2514_v37, %v2513_v12 }
 0x2e8   : > { %3126 = vmatprep.mubr.msk.bf16.mxu0 %vm588_vm1, %v2543_v32 }
 0x2e9   : > { %3127 = vmatmul.mubr.msk.bf16.gmra.mrb[20].mxu0 %vm588_vm1, %v2544_v53 }
 0x30f   : > { %v3098_v51 = vpop.f32.mrb[24].mxu1 }
 0x310   : > { %v2423_v17 = vadd.f32 %v3098_v51, %v5002_v42  ;;  %v2414_v10 = vpop.f32.mrb[25].mxu1 }
 0x311   : > { %v2415_v18 = vadd.f32 %v5002_v42, %v2414_v10  ;;  %v3099_v21 = vpop.f32.mrb[26].mxu1 }
 0x312   : > { %v2426_v20 = vadd.f32 %v3099_v21, %v5002_v42  ;;  %v2417_v40 = vpop.f32.mrb[27].mxu1  ;;  %v2519_v5 = vmax.f32 %v2423_v17, 0.0 }
 0x313   : > { %v2418_v27 = vadd.f32 %v5002_v42, %v2417_v40  ;;  %v2517_v14 = vmax.f32 %v2415_v18, 0.0 }
 0x314   : > { %v2520_v15 = vmax.f32 %v2426_v20, 0.0 }
 0x315   : > { %v2518_v39 = vmax.f32 %v2418_v27, 0.0 }
 0x316   : > { %v2546_v29 = vpack.c.bf16 %v2520_v15, %v2519_v5 }
 0x317   : > { %v2545_v1 = vpack.c.bf16 %v2518_v39, %v2517_v14 }
 0x319   : > { %3130 = vmatprep.mubr.msk.bf16.mxu0 %vm588_vm1, %v2545_v1 }
 0x31a   : > { %3131 = vmatmul.mubr.msk.bf16.gmra.mrb[24].mxu0 %vm588_vm1, %v2546_v29 }
 0x31e   : > { %v3102_v60 = vpop.f32.mrb[28].mxu1 }
 0x31f   : > { %v2439_v31 = vadd.f32 %v3102_v60, %v5002_v42  ;;  %v2430_v47 = vpop.f32.mrb[29].mxu1 }
 0x320   : > { %v2431_v57 = vadd.f32 %v5002_v42, %v2430_v47  ;;  %v3103_v24 = vpop.f32.mrb[30].mxu1 }
 0x321   : > { %v2442_v26 = vadd.f32 %v3103_v24, %v5002_v42  ;;  %v2433_v62 = vpop.f32.mrb[31].mxu1  ;;  %v2523_v30 = vmax.f32 %v2439_v31, 0.0 }
 0x322   : > { %v2434_v33 = vadd.f32 %v5002_v42, %v2433_v62  ;;  %v2521_v22 = vmax.f32 %v2431_v57, 0.0 }
 0x323   : > { %v2524_v19 = vmax.f32 %v2442_v26, 0.0 }
 0x324   : > { %v2522_v38 = vmax.f32 %v2434_v33, 0.0  ;;  %v5055_v33 = vld [vmem:[%s5201_s6] ss:$0 sm:$0xff] }
 0x325   : > { %v2548_v36 = vpack.c.bf16 %v2524_v19, %v2523_v30 }
 0x326   : > { %v2547_v6 = vpack.c.bf16 %v2522_v38, %v2521_v22  ;;  %v3106_v11 = vpop.f32.mrb[32].mxu1 }
 0x327   : > { %v2455_v52 = vadd.f32 %v3106_v11, %v5002_v42  ;;  %v2446_v46 = vpop.f32.mrb[33].mxu1 }
 0x328   : > { %v2447_v3 = vadd.f32 %v5002_v42, %v2446_v46  ;;  %v3107_v8 = vpop.f32.mrb[34].mxu1  ;;  %3134 = vmatprep.mubr.msk.bf16.mxu0 %vm588_vm1, %v2547_v6  ;;  %v3825_v46 = vld [vmem:[%s3932_s9] sm:$0xff] }
 0x329   : > { %v2458_v50 = vadd.f32 %v3107_v8, %v5002_v42  ;;  %v2449_v61 = vpop.f32.mrb[35].mxu1  ;;  %3135 = vmatmul.mubr.msk.bf16.gmra.mrb[28].mxu0 %vm588_vm1, %v2548_v36  ;;  %v2527_v34 = vmax.f32 %v2455_v52, 0.0  ;;  %v3824_v36 = vld [vmem:[%s3932_s9 + $0x10] sm:$0xff] }
 0x32a   : > { %v2450_v0 = vadd.f32 %v5002_v42, %v2449_v61  ;;  %v2525_v58 = vmax.f32 %v2447_v3, 0.0  ;;  %v3826_v61 = vld [vmem:[%s3932_s9 + $0x18] sm:$0xff] }
 0x32b   : > { %v2528_v41 = vmax.f32 %v2458_v50, 0.0 }
 0x32c   : > { %v2526_v56 = vmax.f32 %v2450_v0, 0.0 }
 0x32d   : > { %v2550_v63 = vpack.c.bf16 %v2528_v41, %v2527_v34  ;;  %v3827_v41 = vld [vmem:[%s3932_s9 + $0x8] sm:$0xff] }
 0x32e   : > { %v2549_v9 = vpack.c.bf16 %v2526_v56, %v2525_v58  ;;  %v3110_v54 = vpop.f32.mrb[36].mxu1 }
 0x32f   : > { %v2471_v45 = vadd.f32 %v3110_v54, %v5002_v42  ;;  %v2462_v7 = vpop.f32.mrb[37].mxu1 }
 0x330   : > { %v2463_v49 = vadd.f32 %v5002_v42, %v2462_v7  ;;  %v3111_v25 = vpop.f32.mrb[38].mxu1  ;;  %3138 = vmatprep.mubr.msk.bf16.mxu0 %vm588_vm1, %v2549_v9 }
 0x331   : > { %v2474_v28 = vadd.f32 %v3111_v25, %v5002_v42  ;;  %v2465_v44 = vpop.f32.mrb[39].mxu1  ;;  %3139 = vmatmul.mubr.msk.bf16.gmra.mrb[32].mxu0 %vm588_vm1, %v2550_v63  ;;  %v2531_v35 = vmax.f32 %v2471_v45, 0.0  ;;  %v3828_v25 = vld [vmem:[%s3932_s9 + $0x30] sm:$0xff] }
 0x332   : > { %v2466_v43 = vadd.f32 %v5002_v42, %v2465_v44  ;;  %v2529_v2 = vmax.f32 %v2463_v49, 0.0 }
 0x333   : > { %v2532_v59 = vmax.f32 %v2474_v28, 0.0 }
 0x334   : > { %v2530_v13 = vmax.f32 %v2466_v43, 0.0 }
 0x335   : > { %v2552_v23 = vpack.c.bf16 %v2532_v59, %v2531_v35  ;;  %v3829_v35 = vld [vmem:[%s3932_s9 + $0x20] sm:$0xff] }
 0x336   : > { %v2551_v48 = vpack.c.bf16 %v2530_v13, %v2529_v2  ;;  %v3114_v55 = vpop.f32.mrb[40].mxu1 }
 0x337   : > { %v2487_v4 = vadd.f32 %v3114_v55, %v5002_v42  ;;  %v2478_v16 = vpop.f32.mrb[41].mxu1 }
 0x338   : > { %v2479_v12 = vadd.f32 %v5002_v42, %v2478_v16  ;;  %v3115_v37 = vpop.f32.mrb[42].mxu1  ;;  %3142 = vmatprep.mubr.msk.bf16.mxu0 %vm588_vm1, %v2551_v48 }
 0x339   : > { %v2490_v53 = vadd.f32 %v3115_v37, %v5002_v42  ;;  %v2481_v32 = vpop.f32.mrb[43].mxu1  ;;  %3143 = vmatmul.mubr.msk.bf16.gmra.mrb[36].mxu0 %vm588_vm1, %v2552_v23  ;;  %v2535_v17 = vmax.f32 %v2487_v4, 0.0  ;;  %v3830_v23 = vld [vmem:[%s3932_s9 + $0x38] sm:$0xff]  ;;  %v3831_v4 = vld [vmem:[%s3932_s9 + $0x28] sm:$0xff] }
 0x33a   : > { %v2482_v51 = vadd.f32 %v5002_v42, %v2481_v32  ;;  %v2533_v18 = vmax.f32 %v2479_v12, 0.0 }
 0x33b   : > { %v2536_v10 = vmax.f32 %v2490_v53, 0.0 }
 0x33c   : > { %v2534_v21 = vmax.f32 %v2482_v51, 0.0 }
 0x33d   : > { %v2554_v20 = vpack.c.bf16 %v2536_v10, %v2535_v17 }
 0x33e   : > { %v2553_v40 = vpack.c.bf16 %v2534_v21, %v2533_v18  ;;  %v3832_v18 = vld [vmem:[%s3932_s9 + $0x50] sm:$0xff] }
 0x340   : > { %v3118_v27 = vpop.f32.mrb[44].mxu1  ;;  %3146 = vmatprep.mubr.msk.bf16.mxu0 %vm588_vm1, %v2553_v40 }
 0x341   : > { %v2503_v5 = vadd.f32 %v3118_v27, %v5002_v42  ;;  %v2494_v15 = vpop.f32.mrb[45].mxu1  ;;  %3147 = vmatmul.mubr.msk.bf16.gmra.mrb[40].mxu0 %vm588_vm1, %v2554_v20  ;;  %v3833_v27 = vld [vmem:[%s3932_s9 + $0x40] sm:$0xff] }
 0x342   : > { %v2495_v14 = vadd.f32 %v5002_v42, %v2494_v15  ;;  %v3119_v39 = vpop.f32.mrb[46].mxu1 }
 0x343   : > { %v2506_v29 = vadd.f32 %v3119_v39, %v5002_v42  ;;  %v2497_v1 = vpop.f32.mrb[47].mxu1  ;;  %v2539_v31 = vmax.f32 %v2503_v5, 0.0  ;;  %v3834_v39 = vld [vmem:[%s3932_s9 + $0x58] sm:$0xff] }
 0x344   : > { %v2498_v60 = vadd.f32 %v5002_v42, %v2497_v1  ;;  %v2537_v57 = vmax.f32 %v2495_v14, 0.0 }
 0x345   : > { %v2540_v47 = vmax.f32 %v2506_v29, 0.0 }
 0x346   : > { %v2538_v24 = vmax.f32 %v2498_v60, 0.0  ;;  %v3835_v60 = vld [vmem:[%s3932_s9 + $0x48] sm:$0xff] }
 0x347   : > { %v2556_v26 = vpack.c.bf16 %v2540_v47, %v2539_v31 }
 0x348   : > { %v2555_v62 = vpack.c.bf16 %v2538_v24, %v2537_v57 }
 0x34a   : > { %3150 = vmatprep.mubr.msk.bf16.mxu0 %vm588_vm1, %v2555_v62 }
 0x34b   : > { %3151 = vmatmul.mubr.msk.bf16.gmra.mrb[44].mxu0 %vm588_vm1, %v2556_v26 }
 0x384   : > { %v3124_v30 = vpop.f32.mrb[16].mxu0 }
 0x385   : > { %v2659_v42 = vadd.f32 %v3124_v30, %v5055_v33  ;;  %v2650_v19 = vpop.f32.mrb[17].mxu0 }
 0x386   : > { %v2651_v22 = vadd.f32 %v5055_v33, %v2650_v19  ;;  %v3125_v38 = vpop.f32.mrb[18].mxu0  ;;  %v3836_v19 = vld [vmem:[%s3932_s9 + $0x70] sm:$0xff] }
 0x387   : > { %v2779_v6 = vadd.f32 %v3824_v36, %v2659_v42  ;;  %v2662_v11 = vadd.f32 %v3125_v38, %v5055_v33  ;;  %v2653_v52 = vpop.f32.mrb[19].mxu0 }
 0x388   : > { %v2777_v3 = vadd.f32 %v3825_v46, %v2651_v22  ;;  %v2654_v8 = vadd.f32 %v5055_v33, %v2653_v52 }
 0x389   : > { %v2811_v50 = vmax.f32 %v2779_v6, 0.0  ;;  %v2780_v0 = vadd.f32 %v3826_v61, %v2662_v11  ;;  %v3837_v6 = vld [vmem:[%s3932_s9 + $0x60] sm:$0xff]  ;;  %v3839_v61 = vld [vmem:[%s3932_s9 + $0x68] sm:$0xff] }
 0x38a   : > { %v2809_v34 = vmax.f32 %v2777_v3, 0.0  ;;  %v2778_v58 = vadd.f32 %v3827_v41, %v2654_v8  ;;  %v3838_v3 = vld [vmem:[%s3932_s9 + $0x78] sm:$0xff] }
 0x38b   : > { %2843 = vst.msk [vmem:[%s5066_s15 + $0x10] sm:$0xff] %vm346_vm0, %v2811_v50  ;;  %v2812_v56 = vmax.f32 %v2780_v0, 0.0 }
 0x38c   : > { %2841 = vst.msk [vmem:[%s5066_s15] sm:$0xff] %vm346_vm0, %v2809_v34  ;;  %v2810_v63 = vmax.f32 %v2778_v58, 0.0 }
 0x38d   : > { %2844 = vst.msk [vmem:[%s5066_s15 + $0x18] sm:$0xff] %vm346_vm0, %v2812_v56 }
 0x38e   : > { %2842 = vst.msk [vmem:[%s5066_s15 + $0x8] sm:$0xff] %vm346_vm0, %v2810_v63 }
 0x3bc   : > { %v3128_v9 = vpop.f32.mrb[20].mxu0 }
 0x3bd   : > { %v2675_v54 = vadd.f32 %v3128_v9, %v5055_v33  ;;  %v2666_v45 = vpop.f32.mrb[21].mxu0 }
 0x3be   : > { %v2667_v7 = vadd.f32 %v5055_v33, %v2666_v45  ;;  %v3129_v49 = vpop.f32.mrb[22].mxu0  ;;  %v3840_v45 = vld [vmem:[%s3932_s9 + $0x90] sm:$0xff] }
 0x3bf   : > { %v2783_v28 = vadd.f32 %v3828_v25, %v2675_v54  ;;  %v2678_v44 = vadd.f32 %v3129_v49, %v5055_v33  ;;  %v2669_v43 = vpop.f32.mrb[23].mxu0 }
 0x3c0   : > { %v2781_v59 = vadd.f32 %v3829_v35, %v2667_v7  ;;  %v2670_v2 = vadd.f32 %v5055_v33, %v2669_v43 }
 0x3c1   : > { %v2815_v13 = vmax.f32 %v2783_v28, 0.0  ;;  %v2784_v48 = vadd.f32 %v3830_v23, %v2678_v44  ;;  %v3841_v28 = vld [vmem:[%s3932_s9 + $0x80] sm:$0xff]  ;;  %v3843_v23 = vld [vmem:[%s3932_s9 + $0x88] sm:$0xff] }
 0x3c2   : > { %v2813_v55 = vmax.f32 %v2781_v59, 0.0  ;;  %v2782_v16 = vadd.f32 %v3831_v4, %v2670_v2  ;;  %v3842_v59 = vld [vmem:[%s3932_s9 + $0x98] sm:$0xff] }
 0x3c3   : > { %2847 = vst.msk [vmem:[%s5066_s15 + $0x30] sm:$0xff] %vm346_vm0, %v2815_v13  ;;  %v2816_v12 = vmax.f32 %v2784_v48, 0.0 }
 0x3c4   : > { %2845 = vst.msk [vmem:[%s5066_s15 + $0x20] sm:$0xff] %vm346_vm0, %v2813_v55  ;;  %v2814_v37 = vmax.f32 %v2782_v16, 0.0 }
 0x3c5   : > { %2848 = vst.msk [vmem:[%s5066_s15 + $0x38] sm:$0xff] %vm346_vm0, %v2816_v12 }
 0x3c6   : > { %2846 = vst.msk [vmem:[%s5066_s15 + $0x28] sm:$0xff] %vm346_vm0, %v2814_v37 }
 0x3ed   : > { %v3132_v53 = vpop.f32.mrb[24].mxu0 }
 0x3ee   : > { %v2691_v32 = vadd.f32 %v3132_v53, %v5055_v33  ;;  %v2682_v51 = vpop.f32.mrb[25].mxu0 }
 0x3ef   : > { %v2683_v17 = vadd.f32 %v5055_v33, %v2682_v51  ;;  %v3133_v10 = vpop.f32.mrb[26].mxu0  ;;  %v3844_v51 = vld [vmem:[%s3932_s9 + $0xb0] sm:$0xff] }
 0x3f0   : > { %v2787_v21 = vadd.f32 %v3832_v18, %v2691_v32  ;;  %v2694_v20 = vadd.f32 %v3133_v10, %v5055_v33  ;;  %v2685_v40 = vpop.f32.mrb[27].mxu0 }
 0x3f1   : > { %v2785_v5 = vadd.f32 %v3833_v27, %v2683_v17  ;;  %v2686_v15 = vadd.f32 %v5055_v33, %v2685_v40 }
 0x3f2   : > { %v2819_v14 = vmax.f32 %v2787_v21, 0.0  ;;  %v2788_v29 = vadd.f32 %v3834_v39, %v2694_v20  ;;  %v3845_v21 = vld [vmem:[%s3932_s9 + $0xa0] sm:$0xff]  ;;  %v3847_v39 = vld [vmem:[%s3932_s9 + $0xa8] sm:$0xff] }
 0x3f3   : > { %v2817_v1 = vmax.f32 %v2785_v5, 0.0  ;;  %v2786_v31 = vadd.f32 %v3835_v60, %v2686_v15  ;;  %v3846_v5 = vld [vmem:[%s3932_s9 + $0xb8] sm:$0xff] }
 0x3f4   : > { %2851 = vst.msk [vmem:[%s5066_s15 + $0x50] sm:$0xff] %vm346_vm0, %v2819_v14  ;;  %v2820_v47 = vmax.f32 %v2788_v29, 0.0 }
 0x3f5   : > { %2849 = vst.msk [vmem:[%s5066_s15 + $0x40] sm:$0xff] %vm346_vm0, %v2817_v1  ;;  %v2818_v57 = vmax.f32 %v2786_v31, 0.0 }
 0x3f6   : > { %2852 = vst.msk [vmem:[%s5066_s15 + $0x58] sm:$0xff] %vm346_vm0, %v2820_v47 }
 0x3f7   : > { %2850 = vst.msk [vmem:[%s5066_s15 + $0x48] sm:$0xff] %vm346_vm0, %v2818_v57 }
 0x3fc   : > { %v3136_v24 = vpop.f32.mrb[28].mxu0 }
 0x3fd   : > { %v2707_v26 = vadd.f32 %v3136_v24, %v5055_v33  ;;  %v2698_v62 = vpop.f32.mrb[29].mxu0 }
 0x3fe   : > { %v2699_v30 = vadd.f32 %v5055_v33, %v2698_v62  ;;  %v3137_v42 = vpop.f32.mrb[30].mxu0  ;;  %v3848_v62 = vld [vmem:[%s3932_s9 + $0xd0] sm:$0xff] }
 0x3ff   : > { %v2791_v22 = vadd.f32 %v3836_v19, %v2707_v26  ;;  %v2710_v38 = vadd.f32 %v3137_v42, %v5055_v33  ;;  %v2701_v36 = vpop.f32.mrb[31].mxu0 }
 0x400   : > { %v2789_v11 = vadd.f32 %v3837_v6, %v2699_v30  ;;  %v2702_v52 = vadd.f32 %v5055_v33, %v2701_v36 }
 0x401   : > { %v2823_v46 = vmax.f32 %v2791_v22, 0.0  ;;  %v2792_v8 = vadd.f32 %v3838_v3, %v2710_v38  ;;  %v3849_v22 = vld [vmem:[%s3932_s9 + $0xc0] sm:$0xff]  ;;  %v3851_v3 = vld [vmem:[%s3932_s9 + $0xc8] sm:$0xff] }
 0x402   : > { %v2821_v50 = vmax.f32 %v2789_v11, 0.0  ;;  %v2790_v0 = vadd.f32 %v3839_v61, %v2702_v52  ;;  %v3850_v11 = vld [vmem:[%s3932_s9 + $0xd8] sm:$0xff] }
 0x403   : > { %2855 = vst.msk [vmem:[%s5066_s15 + $0x70] sm:$0xff] %vm346_vm0, %v2823_v46  ;;  %v2824_v34 = vmax.f32 %v2792_v8, 0.0 }
 0x404   : > { %2853 = vst.msk [vmem:[%s5066_s15 + $0x60] sm:$0xff] %vm346_vm0, %v2821_v50  ;;  %v2822_v41 = vmax.f32 %v2790_v0, 0.0  ;;  %v3140_v58 = vpop.f32.mrb[32].mxu0 }
 0x405   : > { %2856 = vst.msk [vmem:[%s5066_s15 + $0x78] sm:$0xff] %vm346_vm0, %v2824_v34  ;;  %v2723_v56 = vadd.f32 %v3140_v58, %v5055_v33  ;;  %v2714_v63 = vpop.f32.mrb[33].mxu0 }
 0x406   : > { %2854 = vst.msk [vmem:[%s5066_s15 + $0x68] sm:$0xff] %vm346_vm0, %v2822_v41  ;;  %v2715_v9 = vadd.f32 %v5055_v33, %v2714_v63  ;;  %v3141_v54 = vpop.f32.mrb[34].mxu0  ;;  %v3852_v63 = vld [vmem:[%s3932_s9 + $0xf0] sm:$0xff] }
 0x407   : > { %v2795_v7 = vadd.f32 %v3840_v45, %v2723_v56  ;;  %v2726_v49 = vadd.f32 %v3141_v54, %v5055_v33  ;;  %v2717_v25 = vpop.f32.mrb[35].mxu0 }
 0x408   : > { %v2793_v44 = vadd.f32 %v3841_v28, %v2715_v9  ;;  %v2718_v43 = vadd.f32 %v5055_v33, %v2717_v25 }
 0x409   : > { %v2827_v35 = vmax.f32 %v2795_v7, 0.0  ;;  %v2796_v2 = vadd.f32 %v3842_v59, %v2726_v49  ;;  %v3853_v7 = vld [vmem:[%s3932_s9 + $0xe0] sm:$0xff]  ;;  %v3855_v59 = vld [vmem:[%s3932_s9 + $0xe8] sm:$0xff] }
 0x40a   : > { %v2825_v13 = vmax.f32 %v2793_v44, 0.0  ;;  %v2794_v48 = vadd.f32 %v3843_v23, %v2718_v43  ;;  %v3854_v44 = vld [vmem:[%s3932_s9 + $0xf8] sm:$0xff] }
 0x40b   : > { %2859 = vst.msk [vmem:[%s5066_s15 + $0x90] sm:$0xff] %vm346_vm0, %v2827_v35  ;;  %v2828_v55 = vmax.f32 %v2796_v2, 0.0 }
 0x40c   : > { %2857 = vst.msk [vmem:[%s5066_s15 + $0x80] sm:$0xff] %vm346_vm0, %v2825_v13  ;;  %v2826_v4 = vmax.f32 %v2794_v48, 0.0  ;;  %v3144_v16 = vpop.f32.mrb[36].mxu0 }
 0x40d   : > { %2860 = vst.msk [vmem:[%s5066_s15 + $0x98] sm:$0xff] %vm346_vm0, %v2828_v55  ;;  %v2739_v12 = vadd.f32 %v3144_v16, %v5055_v33  ;;  %v2730_v37 = vpop.f32.mrb[37].mxu0 }
 0x40e   : > { %2858 = vst.msk [vmem:[%s5066_s15 + $0x88] sm:$0xff] %vm346_vm0, %v2826_v4  ;;  %v2731_v53 = vadd.f32 %v5055_v33, %v2730_v37  ;;  %v3145_v32 = vpop.f32.mrb[38].mxu0 }
 0x40f   : > { %v2799_v17 = vadd.f32 %v3844_v51, %v2739_v12  ;;  %v2742_v10 = vadd.f32 %v3145_v32, %v5055_v33  ;;  %v2733_v18 = vpop.f32.mrb[39].mxu0 }
 0x410   : > { %v2797_v20 = vadd.f32 %v3845_v21, %v2731_v53  ;;  %v2734_v40 = vadd.f32 %v5055_v33, %v2733_v18 }
 0x411   : > { %v2831_v27 = vmax.f32 %v2799_v17, 0.0  ;;  %v2800_v15 = vadd.f32 %v3846_v5, %v2742_v10 }
 0x412   : > { %v2829_v14 = vmax.f32 %v2797_v20, 0.0  ;;  %v2798_v29 = vadd.f32 %v3847_v39, %v2734_v40 }
 0x413   : > { %2863 = vst.msk [vmem:[%s5066_s15 + $0xb0] sm:$0xff] %vm346_vm0, %v2831_v27  ;;  %v2832_v1 = vmax.f32 %v2800_v15, 0.0 }
 0x414   : > { %2861 = vst.msk [vmem:[%s5066_s15 + $0xa0] sm:$0xff] %vm346_vm0, %v2829_v14  ;;  %v2830_v60 = vmax.f32 %v2798_v29, 0.0  ;;  %v3148_v31 = vpop.f32.mrb[40].mxu0 }
 0x415   : > { %2864 = vst.msk [vmem:[%s5066_s15 + $0xb8] sm:$0xff] %vm346_vm0, %v2832_v1  ;;  %v2755_v47 = vadd.f32 %v3148_v31, %v5055_v33  ;;  %v2746_v57 = vpop.f32.mrb[41].mxu0 }
 0x416   : > { %2862 = vst.msk [vmem:[%s5066_s15 + $0xa8] sm:$0xff] %vm346_vm0, %v2830_v60  ;;  %v2747_v24 = vadd.f32 %v5055_v33, %v2746_v57  ;;  %v3149_v26 = vpop.f32.mrb[42].mxu0 }
 0x417   : > { %v2803_v30 = vadd.f32 %v3848_v62, %v2755_v47  ;;  %v2758_v42 = vadd.f32 %v3149_v26, %v5055_v33  ;;  %v2749_v19 = vpop.f32.mrb[43].mxu0 }
 0x418   : > { %v2801_v38 = vadd.f32 %v3849_v22, %v2747_v24  ;;  %v2750_v36 = vadd.f32 %v5055_v33, %v2749_v19 }
 0x419   : > { %v2835_v6 = vmax.f32 %v2803_v30, 0.0  ;;  %v2804_v52 = vadd.f32 %v3850_v11, %v2758_v42 }
 0x41a   : > { %v2833_v46 = vmax.f32 %v2801_v38, 0.0  ;;  %v2802_v8 = vadd.f32 %v3851_v3, %v2750_v36 }
 0x41b   : > { %2867 = vst.msk [vmem:[%s5066_s15 + $0xd0] sm:$0xff] %vm346_vm0, %v2835_v6  ;;  %v2836_v50 = vmax.f32 %v2804_v52, 0.0 }
 0x41c   : > { %2865 = vst.msk [vmem:[%s5066_s15 + $0xc0] sm:$0xff] %vm346_vm0, %v2833_v46  ;;  %v2834_v61 = vmax.f32 %v2802_v8, 0.0 }
 0x41d   : > { %2868 = vst.msk [vmem:[%s5066_s15 + $0xd8] sm:$0xff] %vm346_vm0, %v2836_v50 }
 0x41e   : > { %v3152_v0 = vpop.f32.mrb[44].mxu0  ;;  %2866 = vst.msk [vmem:[%s5066_s15 + $0xc8] sm:$0xff] %vm346_vm0, %v2834_v61 }
 0x41f   : > { %v2771_v34 = vadd.f32 %v3152_v0, %v5055_v33  ;;  %v2762_v41 = vpop.f32.mrb[45].mxu0 }
 0x420   : > { %v2763_v58 = vadd.f32 %v5055_v33, %v2762_v41  ;;  %v3153_v56 = vpop.f32.mrb[46].mxu0 }
 0x421   : > { %v2807_v9 = vadd.f32 %v3852_v63, %v2771_v34  ;;  %v2774_v54 = vadd.f32 %v3153_v56, %v5055_v33  ;;  %v2765_v45 = vpop.f32.mrb[47].mxu0 }
 0x422   : > { %v2805_v49 = vadd.f32 %v3853_v7, %v2763_v58  ;;  %v2766_v25 = vadd.f32 %v5055_v33, %v2765_v45 }
 0x423   : > { %v2839_v28 = vmax.f32 %v2807_v9, 0.0  ;;  %v2808_v43 = vadd.f32 %v3854_v44, %v2774_v54 }
 0x424   : > { %v2837_v35 = vmax.f32 %v2805_v49, 0.0  ;;  %v2806_v2 = vadd.f32 %v3855_v59, %v2766_v25 }
 0x425   : > { %2871 = vst.msk [vmem:[%s5066_s15 + $0xf0] sm:$0xff] %vm346_vm0, %v2839_v28  ;;  %v2840_v13 = vmax.f32 %v2808_v43, 0.0 }
 0x426   : > { %2869 = vst.msk [vmem:[%s5066_s15 + $0xe0] sm:$0xff] %vm346_vm0, %v2837_v35  ;;  %v2838_v23 = vmax.f32 %v2806_v2, 0.0 }
 0x427   : > { %2872 = vst.msk [vmem:[%s5066_s15 + $0xf8] sm:$0xff] %vm346_vm0, %v2840_v13 }
 0x428   : > { %2870 = vst.msk [vmem:[%s5066_s15 + $0xe8] sm:$0xff] %vm346_vm0, %v2838_v23 }
 0x429 PF: > { %s17_s24 = sadd.s32 1, %s3862_s24  }
 0x42a   : > { %p14_p4 = scmp.ge.s32.totalorder %s17_s24, 4  }
 0x42c   :  { %16 = sbr.rel (!%p14_p4) target bundleno = 1 (0x1), region = 80 }

</bundles_post_ra>
